<compile_context>
chip_gen: v7x
topology: tpu7x:2x2x1
jax: 0.10.0
libtpu: 0.0.40
codegen_flags: <defaults>
</compile_context>

<pallas_src>
import jax
import jax.numpy as jnp
from jax import lax
from jax.experimental import pallas as pl
from jax.experimental.pallas import tpu as pltpu

INPUT_DIM = 128
HIDDEN_DIM = 64
NUM_BRANCHES = 3
BRANCH_OUT = 32
OUT_DIM = 10

HID_PAD1 = 128                           # hidden 64 padded to a full lane dim
HID_CAT = NUM_BRANCHES * HIDDEN_DIM      # 192
HID_PAD = 256                            # 192 padded to lane multiple
BR_CAT = NUM_BRANCHES * BRANCH_OUT       # 96
BR_PAD = 128                             # 96 padded to lane multiple
OUT_PAD = 128                            # padded lane width used inside kernel only


# --------------------------------------------------------------------------
# kernel
# --------------------------------------------------------------------------
def toynet_kernel(x_ref,                  # (TB, 128)   input (original dtype)
                  w_in_ref, b_in_ref,     # (128, 128), (1, 128)
                  w1_ref, b1_ref,         # (128, 256), (1, 256)  branch fc1 (concat)
                  w2_ref, b2_ref,         # (256, 128), (1, 128)  branch fc2 (block-diag)
                  wf_ref, bf_ref,         # (128, 128), (1, 128)  fuse
                  wo_ref, bo_ref,         # (128, 128), (1, 128)  output head
                  o_ref):                 # (TB, 10)    narrow log-prob output
    cd = w_in_ref.dtype                   # MXU operand dtype (bf16 or f32)

    # in-kernel cast of x to the MXU operand dtype (no wrapper-side HBM pass)
    x = x_ref[...].astype(cd)                                       # (TB, 128)

    # input layer + ReLU (f32 accumulation, f32 elementwise)
    h = jnp.dot(x, w_in_ref[...], preferred_element_type=jnp.float32)
    h = jnp.maximum(h + b_in_ref[...], 0.0)                         # (TB, 128)

    # all 3 branch fc1's in one wide matmul
    bh = jnp.dot(h.astype(cd), w1_ref[...],
                 preferred_element_type=jnp.float32)
    bh = jnp.maximum(bh + b1_ref[...], 0.0)                         # (TB, 256)

    # all 3 branch fc2's via block-diagonal weight -> already concatenated
    bo_all = jnp.dot(bh.astype(cd), w2_ref[...],
                     preferred_element_type=jnp.float32)
    bo_all = bo_all + b2_ref[...]                                   # (TB, 128)

    # fuse layer + ReLU (padded rows of wf are zero, so padded lanes of
    # bo_all contribute nothing)
    fused = jnp.dot(bo_all.astype(cd), wf_ref[...],
                    preferred_element_type=jnp.float32)
    fused = jnp.maximum(fused + bf_ref[...], 0.0)                   # (TB, 128)
    # dropout: identity (eval mode)

    # output head + ReLU
    inter = jnp.dot(fused.astype(cd), wo_ref[...],
                    preferred_element_type=jnp.float32)
    inter = jnp.maximum(inter + bo_ref[...], 0.0)                   # (TB, 128)

    # SiLU: x * sigmoid(x)
    inter = inter * jax.nn.sigmoid(inter)

    # log_softmax over the first OUT_DIM lanes only (rest are padding)
    lane = lax.broadcasted_iota(jnp.int32, inter.shape, 1)
    z = jnp.where(lane < OUT_DIM, inter, jnp.float32(-1e30))
    m = jnp.max(z, axis=1, keepdims=True)
    z = z - m
    lse = jnp.log(jnp.sum(jnp.exp(z), axis=1, keepdims=True))

    # narrow store: only the OUT_DIM valid lanes go back to HBM
    o_ref[...] = (z - lse)[:, :OUT_DIM].astype(o_ref.dtype)


# --------------------------------------------------------------------------
# wrapper
# --------------------------------------------------------------------------
def _pick_batch_tile(B, requested):
    """Largest multiple-of-8 divisor of B that is <= requested, preferring a
    grid of at least 2 (so both v7x TensorCores get work)."""
    assert B % 8 == 0, B
    divisors = [t for t in range(8, B + 1, 8) if B % t == 0]
    feasible = [t for t in divisors if t <= requested] or [min(divisors)]
    ge2 = [t for t in feasible if B // t >= 2]
    return max(ge2) if ge2 else max(feasible)


def toynet_forward(x, packed, *, batch_tile=1024):
    B = x.shape[0]
    batch_tile = _pick_batch_tile(B, batch_tile)
    grid = (B // batch_tile,)

    (w_in, b_in, w1, b1, w2, b2, wf, bf, wo, bo) = packed

    def full(arr):
        nd = arr.ndim
        return pl.BlockSpec(arr.shape, lambda i, _n=nd: (0,) * _n)

    # advisory cost estimate so XLA can schedule around this call
    flops = 2 * B * (INPUT_DIM * HID_PAD1 + HID_PAD1 * HID_PAD
                     + HID_PAD * BR_PAD + BR_PAD * HID_PAD1
                     + HID_PAD1 * OUT_PAD)
    transcendentals = B * (4 * OUT_PAD + 1)   # sigmoid(exp+recip) + exp + log
    bytes_accessed = (x.size * x.dtype.itemsize + B * OUT_DIM * 4
                      + sum(int(p.size) * p.dtype.itemsize for p in packed))
    cost = pl.CostEstimate(flops=flops, transcendentals=transcendentals,
                           bytes_accessed=bytes_accessed)

    # explicit VMEM limit only needed if the tile is pushed very large
    cp_kwargs = dict(dimension_semantics=("parallel",))
    if batch_tile > 2048:
        cp_kwargs["vmem_limit_bytes"] = 48 << 20

    out = pl.pallas_call(
        toynet_kernel,
        out_shape=jax.ShapeDtypeStruct((B, OUT_DIM), jnp.float32),
        grid_spec=pltpu.PrefetchScalarGridSpec(
            num_scalar_prefetch=0,
            grid=grid,
            in_specs=[
                pl.BlockSpec((batch_tile, INPUT_DIM), lambda i: (i, 0)),
                full(w_in), full(b_in),
                full(w1), full(b1),
                full(w2), full(b2),
                full(wf), full(bf),
                full(wo), full(bo),
            ],
            out_specs=pl.BlockSpec((batch_tile, OUT_DIM), lambda i: (i, 0)),
        ),
        compiler_params=pltpu.CompilerParams(**cp_kwargs),
        cost_estimate=cost,
    )(x, w_in, b_in, w1, b1, w2, b2, wf, bf, wo, bo)

    return out


# --------------------------------------------------------------------------
# parameters: raw (torch-like, per-branch) and packed (folded / padded)
# --------------------------------------------------------------------------
def init_raw_params(key):
    """Deterministic init matching nn.Linear; weights stored [in, out]."""
    ks = jax.random.split(key, 12)

    def lin(k, fan_in, fan_out):
        kw, kb = jax.random.split(k)
        s = 1.0 / jnp.sqrt(fan_in)
        w = jax.random.uniform(kw, (fan_in, fan_out), jnp.float32, -s, s)
        b = jax.random.uniform(kb, (1, fan_out), jnp.float32, -s, s)
        return w, b

    w_in, b_in = lin(ks[0], INPUT_DIM, HIDDEN_DIM)
    w1s, b1s, w2s, b2s = [], [], [], []
    for i in range(NUM_BRANCHES):
        w1, b1 = lin(ks[1 + 2 * i], HIDDEN_DIM, HIDDEN_DIM)
        w2, b2 = lin(ks[2 + 2 * i], HIDDEN_DIM, BRANCH_OUT)
        w1s.append(w1); b1s.append(b1); w2s.append(w2); b2s.append(b2)
    wf, bf = lin(ks[7], BR_CAT, HIDDEN_DIM)
    wo, bo = lin(ks[8], HIDDEN_DIM, OUT_DIM)
    return (w_in, b_in, w1s, b1s, w2s, b2s, wf, bf, wo, bo)


def pack_params(raw, compute_dtype=jnp.bfloat16):
    """Fold branches into wide / block-diagonal matmuls and pad all hidden
    dims to full 128-lane widths.  Weights cast to `compute_dtype` (MXU
    operands, bf16 by default); biases stay f32 (elementwise math is f32)."""
    (w_in, b_in, w1s, b1s, w2s, b2s, wf, bf, wo, bo) = raw

    # input layer: pad out cols 64 -> 128
    W_in = jnp.pad(w_in, ((0, 0), (0, HID_PAD1 - HIDDEN_DIM)))
    B_in = jnp.pad(b_in, ((0, 0), (0, HID_PAD1 - HIDDEN_DIM)))

    # branch fc1: concat along out axis, pad rows 64 -> 128, cols 192 -> 256
    W1 = jnp.concatenate(w1s, axis=1)
    W1 = jnp.pad(W1, ((0, HID_PAD1 - HIDDEN_DIM), (0, HID_PAD - HID_CAT)))
    B1 = jnp.pad(jnp.concatenate(b1s, axis=1), ((0, 0), (0, HID_PAD - HID_CAT)))

    # branch fc2: block-diagonal (256, 128), off-diagonal / padding exact zeros
    W2 = jnp.zeros((HID_PAD, BR_PAD), jnp.float32)
    for i in range(NUM_BRANCHES):
        W2 = W2.at[i * HIDDEN_DIM:(i + 1) * HIDDEN_DIM,
                   i * BRANCH_OUT:(i + 1) * BRANCH_OUT].set(w2s[i])
    B2 = jnp.pad(jnp.concatenate(b2s, axis=1), ((0, 0), (0, BR_PAD - BR_CAT)))

    # fuse: pad rows 96 -> 128 and cols 64 -> 128
    Wf = jnp.pad(wf, ((0, BR_PAD - BR_CAT), (0, HID_PAD1 - HIDDEN_DIM)))
    Bf = jnp.pad(bf, ((0, 0), (0, HID_PAD1 - HIDDEN_DIM)))

    # output head: pad rows 64 -> 128 and cols 10 -> 128
    Wo = jnp.pad(wo, ((0, HID_PAD1 - HIDDEN_DIM), (0, OUT_PAD - OUT_DIM)))
    Bo = jnp.pad(bo, ((0, 0), (0, OUT_PAD - OUT_DIM)))

    cd = compute_dtype
    f32 = jnp.float32
    return (W_in.astype(cd), B_in.astype(f32),
            W1.astype(cd), B1.astype(f32),
            W2.astype(cd), B2.astype(f32),
            Wf.astype(cd), Bf.astype(f32),
            Wo.astype(cd), Bo.astype(f32))


# --------------------------------------------------------------------------
# pure-JAX reference (unfolded, matches the PyTorch forward in eval mode)
# --------------------------------------------------------------------------
def toynet_reference(x, raw):
    (w_in, b_in, w1s, b1s, w2s, b2s, wf, bf, wo, bo) = raw
    hp = lax.Precision.HIGHEST
    h = jax.nn.relu(jnp.dot(x, w_in, precision=hp) + b_in)
    outs = []
    for i in range(NUM_BRANCHES):
        bh = jax.nn.relu(jnp.dot(h, w1s[i], precision=hp) + b1s[i])
        outs.append(jnp.dot(bh, w2s[i], precision=hp) + b2s[i])
    fused = jnp.concatenate(outs, axis=1)
    fused = jax.nn.relu(jnp.dot(fused, wf, precision=hp) + bf)
    inter = jax.nn.relu(jnp.dot(fused, wo, precision=hp) + bo)
    inter = inter * jax.nn.sigmoid(inter)
    return jax.nn.log_softmax(inter, axis=1)


if __name__ == "__main__":
    key = jax.random.PRNGKey(0)
    k_x, k_p = jax.random.split(key)

    B = 256                                   # small test batch; grid = 2
    x = jax.random.normal(k_x, (B, INPUT_DIM), jnp.float32)
    raw = init_raw_params(k_p)
    ref = toynet_reference(x, raw)

    # production path: bf16 MXU operands, f32 accumulation / epilogue
    packed_bf16 = pack_params(raw)            # default compute_dtype=bf16
    out_bf16 = jax.block_until_ready(toynet_forward(x, packed_bf16))
    assert out_bf16.shape == (B, OUT_DIM)
    assert jnp.allclose(out_bf16, ref, atol=1e-1, rtol=1e-1), "bf16 mismatch"

    # f32 debug / correctness path
    packed_f32 = pack_params(raw, jnp.float32)
    out_f32 = jax.block_until_ready(toynet_forward(x, packed_f32))
    assert out_f32.shape == (B, OUT_DIM)
    assert jnp.allclose(out_f32, ref, atol=1e-3, rtol=1e-3), "f32 mismatch"

    print("KERNEL_OK")
</pallas_src>

<mosaic_0001>
module attributes {stable_mosaic.version = 11 : i64} {
  func.func @toynet_kernel(%arg0: i32, %arg1: memref<128x128xf32, #tpu.memory_space<vmem>>, %arg2: memref<128x128xbf16, #tpu.memory_space<vmem>>, %arg3: memref<1x128xf32, #tpu.memory_space<vmem>>, %arg4: memref<128x256xbf16, #tpu.memory_space<vmem>>, %arg5: memref<1x256xf32, #tpu.memory_space<vmem>>, %arg6: memref<256x128xbf16, #tpu.memory_space<vmem>>, %arg7: memref<1x128xf32, #tpu.memory_space<vmem>>, %arg8: memref<128x128xbf16, #tpu.memory_space<vmem>>, %arg9: memref<1x128xf32, #tpu.memory_space<vmem>>, %arg10: memref<128x128xbf16, #tpu.memory_space<vmem>>, %arg11: memref<1x128xf32, #tpu.memory_space<vmem>>, %arg12: memref<128x10xf32, #tpu.memory_space<vmem>>) attributes {dimension_semantics = [#tpu.dimension_semantics<parallel>], iteration_bounds = array<i64: 2>, scalar_prefetch = 0 : i64, scratch_operands = 0 : i64, tpu.core_type = #tpu.core_type<tc>, window_params = [{transform_indices = @transform_0, window_bounds = array<i64: 128, 128>}, {pipeline_mode = #tpu.pipeline_mode<synchronous>, transform_indices = @transform_1, window_bounds = array<i64: 128, 128>}, {pipeline_mode = #tpu.pipeline_mode<synchronous>, transform_indices = @transform_2, window_bounds = array<i64: 1, 128>}, {pipeline_mode = #tpu.pipeline_mode<synchronous>, transform_indices = @transform_3, window_bounds = array<i64: 128, 256>}, {pipeline_mode = #tpu.pipeline_mode<synchronous>, transform_indices = @transform_4, window_bounds = array<i64: 1, 256>}, {pipeline_mode = #tpu.pipeline_mode<synchronous>, transform_indices = @transform_5, window_bounds = array<i64: 256, 128>}, {pipeline_mode = #tpu.pipeline_mode<synchronous>, transform_indices = @transform_6, window_bounds = array<i64: 1, 128>}, {pipeline_mode = #tpu.pipeline_mode<synchronous>, transform_indices = @transform_7, window_bounds = array<i64: 128, 128>}, {pipeline_mode = #tpu.pipeline_mode<synchronous>, transform_indices = @transform_8, window_bounds = array<i64: 1, 128>}, {pipeline_mode = #tpu.pipeline_mode<synchronous>, transform_indices = @transform_9, window_bounds = array<i64: 128, 128>}, {pipeline_mode = #tpu.pipeline_mode<synchronous>, transform_indices = @transform_10, window_bounds = array<i64: 1, 128>}, {transform_indices = @transform_11, window_bounds = array<i64: 128, 10>}]} {
    %c0 = arith.constant 0 : index
    %c0_0 = arith.constant 0 : index
    %0 = vector.load %arg1[%c0, %c0_0] : memref<128x128xf32, #tpu.memory_space<vmem>>, vector<128x128xf32>
    %1 = arith.truncf %0 : vector<128x128xf32> to vector<128x128xbf16>
    %c0_1 = arith.constant 0 : index
    %c0_2 = arith.constant 0 : index
    %2 = vector.load %arg2[%c0_1, %c0_2] : memref<128x128xbf16, #tpu.memory_space<vmem>>, vector<128x128xbf16>
    %cst = arith.constant dense<0.000000e+00> : vector<128x128xf32>
    %3 = tpu.matmul %1, %2, %cst {dimension_numbers = #tpu.dot_dimension_numbers<[1], [0], [0], [1], [0, 0, 1, 1], [], []>} : vector<128x128xbf16>, vector<128x128xbf16>, vector<128x128xf32> -> vector<128x128xf32>
    %c0_3 = arith.constant 0 : index
    %c0_4 = arith.constant 0 : index
    %4 = vector.load %arg3[%c0_3, %c0_4] : memref<1x128xf32, #tpu.memory_space<vmem>>, vector<1x128xf32>
    %5 = vector.broadcast %4 : vector<1x128xf32> to vector<128x128xf32>
    %6 = arith.addf %3, %5 : vector<128x128xf32>
    %cst_5 = arith.constant 0.000000e+00 : f32
    %7 = vector.broadcast %cst_5 : f32 to vector<128x128xf32>
    %8 = arith.maximumf %6, %7 : vector<128x128xf32>
    %9 = arith.truncf %8 : vector<128x128xf32> to vector<128x128xbf16>
    %c0_6 = arith.constant 0 : index
    %c0_7 = arith.constant 0 : index
    %10 = vector.load %arg4[%c0_6, %c0_7] : memref<128x256xbf16, #tpu.memory_space<vmem>>, vector<128x256xbf16>
    %cst_8 = arith.constant dense<0.000000e+00> : vector<128x256xf32>
    %11 = tpu.matmul %9, %10, %cst_8 {dimension_numbers = #tpu.dot_dimension_numbers<[1], [0], [0], [1], [0, 0, 1, 1], [], []>} : vector<128x128xbf16>, vector<128x256xbf16>, vector<128x256xf32> -> vector<128x256xf32>
    %c0_9 = arith.constant 0 : index
    %c0_10 = arith.constant 0 : index
    %12 = vector.load %arg5[%c0_9, %c0_10] : memref<1x256xf32, #tpu.memory_space<vmem>>, vector<1x256xf32>
    %13 = vector.broadcast %12 : vector<1x256xf32> to vector<128x256xf32>
    %14 = arith.addf %11, %13 : vector<128x256xf32>
    %cst_11 = arith.constant 0.000000e+00 : f32
    %15 = vector.broadcast %cst_11 : f32 to vector<128x256xf32>
    %16 = arith.maximumf %14, %15 : vector<128x256xf32>
    %17 = arith.truncf %16 : vector<128x256xf32> to vector<128x256xbf16>
    %c0_12 = arith.constant 0 : index
    %c0_13 = arith.constant 0 : index
    %18 = vector.load %arg6[%c0_12, %c0_13] : memref<256x128xbf16, #tpu.memory_space<vmem>>, vector<256x128xbf16>
    %cst_14 = arith.constant dense<0.000000e+00> : vector<128x128xf32>
    %19 = tpu.matmul %17, %18, %cst_14 {dimension_numbers = #tpu.dot_dimension_numbers<[1], [0], [0], [1], [0, 0, 1, 1], [], []>} : vector<128x256xbf16>, vector<256x128xbf16>, vector<128x128xf32> -> vector<128x128xf32>
    %c0_15 = arith.constant 0 : index
    %c0_16 = arith.constant 0 : index
    %20 = vector.load %arg7[%c0_15, %c0_16] : memref<1x128xf32, #tpu.memory_space<vmem>>, vector<1x128xf32>
    %21 = vector.broadcast %20 : vector<1x128xf32> to vector<128x128xf32>
    %22 = arith.addf %19, %21 : vector<128x128xf32>
    %23 = arith.truncf %22 : vector<128x128xf32> to vector<128x128xbf16>
    %c0_17 = arith.constant 0 : index
    %c0_18 = arith.constant 0 : index
    %24 = vector.load %arg8[%c0_17, %c0_18] : memref<128x128xbf16, #tpu.memory_space<vmem>>, vector<128x128xbf16>
    %cst_19 = arith.constant dense<0.000000e+00> : vector<128x128xf32>
    %25 = tpu.matmul %23, %24, %cst_19 {dimension_numbers = #tpu.dot_dimension_numbers<[1], [0], [0], [1], [0, 0, 1, 1], [], []>} : vector<128x128xbf16>, vector<128x128xbf16>, vector<128x128xf32> -> vector<128x128xf32>
    %c0_20 = arith.constant 0 : index
    %c0_21 = arith.constant 0 : index
    %26 = vector.load %arg9[%c0_20, %c0_21] : memref<1x128xf32, #tpu.memory_space<vmem>>, vector<1x128xf32>
    %27 = vector.broadcast %26 : vector<1x128xf32> to vector<128x128xf32>
    %28 = arith.addf %25, %27 : vector<128x128xf32>
    %cst_22 = arith.constant 0.000000e+00 : f32
    %29 = vector.broadcast %cst_22 : f32 to vector<128x128xf32>
    %30 = arith.maximumf %28, %29 : vector<128x128xf32>
    %31 = arith.truncf %30 : vector<128x128xf32> to vector<128x128xbf16>
    %c0_23 = arith.constant 0 : index
    %c0_24 = arith.constant 0 : index
    %32 = vector.load %arg10[%c0_23, %c0_24] : memref<128x128xbf16, #tpu.memory_space<vmem>>, vector<128x128xbf16>
    %cst_25 = arith.constant dense<0.000000e+00> : vector<128x128xf32>
    %33 = tpu.matmul %31, %32, %cst_25 {dimension_numbers = #tpu.dot_dimension_numbers<[1], [0], [0], [1], [0, 0, 1, 1], [], []>} : vector<128x128xbf16>, vector<128x128xbf16>, vector<128x128xf32> -> vector<128x128xf32>
    %c0_26 = arith.constant 0 : index
    %c0_27 = arith.constant 0 : index
    %34 = vector.load %arg11[%c0_26, %c0_27] : memref<1x128xf32, #tpu.memory_space<vmem>>, vector<1x128xf32>
    %35 = vector.broadcast %34 : vector<1x128xf32> to vector<128x128xf32>
    %36 = arith.addf %33, %35 : vector<128x128xf32>
    %cst_28 = arith.constant 0.000000e+00 : f32
    %37 = vector.broadcast %cst_28 : f32 to vector<128x128xf32>
    %38 = arith.maximumf %36, %37 : vector<128x128xf32>
    %39 = arith.negf %38 : vector<128x128xf32>
    %40 = math.exp %39 : vector<128x128xf32>
    %cst_29 = arith.constant 1.000000e+00 : f32
    %41 = vector.broadcast %cst_29 : f32 to vector<128x128xf32>
    %42 = arith.addf %41, %40 : vector<128x128xf32>
    %43 = arith.divf %41, %42 : vector<128x128xf32>
    %44 = arith.mulf %38, %43 : vector<128x128xf32>
    %45 = tpu.iota {dimensions = array<i32: 1>} : vector<128x128xi32>
    %c10_i32 = arith.constant 10 : i32
    %46 = vector.broadcast %c10_i32 : i32 to vector<128x128xi32>
    %47 = arith.cmpi slt, %45, %46 : vector<128x128xi32>
    %cst_30 = arith.constant -1.000000e+30 : f32
    %48 = vector.broadcast %cst_30 : f32 to vector<128x128xf32>
    %49 = arith.select %47, %44, %48 : vector<128x128xi1>, vector<128x128xf32>
    %cst_31 = arith.constant dense<0xFF800000> : vector<128xf32>
    %50 = vector.multi_reduction <maximumf>, %49, %cst_31 [1] : vector<128x128xf32> to vector<128xf32>
    %51 = vector.shape_cast %50 : vector<128xf32> to vector<128x1xf32>
    %52 = vector.broadcast %51 : vector<128x1xf32> to vector<128x128xf32>
    %53 = arith.subf %49, %52 : vector<128x128xf32>
    %54 = math.exp %53 : vector<128x128xf32>
    %cst_32 = arith.constant dense<0.000000e+00> : vector<128xf32>
    %55 = vector.multi_reduction <add>, %54, %cst_32 [1] : vector<128x128xf32> to vector<128xf32>
    %56 = vector.shape_cast %55 : vector<128xf32> to vector<128x1xf32>
    %57 = math.log %56 : vector<128x1xf32>
    %58 = vector.broadcast %57 : vector<128x1xf32> to vector<128x128xf32>
    %59 = arith.subf %53, %58 : vector<128x128xf32>
    %60 = vector.extract_strided_slice %59 {offsets = [0, 0], sizes = [128, 10], strides = [1, 1]} : vector<128x128xf32> to vector<128x10xf32>
    %c0_33 = arith.constant 0 : index
    %c0_34 = arith.constant 0 : index
    %61 = vector.load %arg12[%c0_33, %c0_34] : memref<128x10xf32, #tpu.memory_space<vmem>>, vector<128x10xf32>
    tpu.vector_store %arg12[%c0_33, %c0_34], %60 {strides = array<i32>} : memref<128x10xf32, #tpu.memory_space<vmem>>, vector<128x10xf32>,
    return
  }
  func.func @transform_0(%arg0: i32) -> (i32, i32) {
    %c0_i32 = arith.constant 0 : i32
    %c0_i32_0 = arith.constant 0 : i32
    return %arg0, %c0_i32 : i32, i32
  }
  func.func @transform_1(%arg0: i32) -> (i32, i32) {
    %c0_i32 = arith.constant 0 : i32
    %c0_i32_0 = arith.constant 0 : i32
    %c0_i32_1 = arith.constant 0 : i32
    return %c0_i32, %c0_i32_0 : i32, i32
  }
  func.func @transform_2(%arg0: i32) -> (i32, i32) {
    %c0_i32 = arith.constant 0 : i32
    %c0_i32_0 = arith.constant 0 : i32
    %c0_i32_1 = arith.constant 0 : i32
    return %c0_i32, %c0_i32_0 : i32, i32
  }
  func.func @transform_3(%arg0: i32) -> (i32, i32) {
    %c0_i32 = arith.constant 0 : i32
    %c0_i32_0 = arith.constant 0 : i32
    %c0_i32_1 = arith.constant 0 : i32
    return %c0_i32, %c0_i32_0 : i32, i32
  }
  func.func @transform_4(%arg0: i32) -> (i32, i32) {
    %c0_i32 = arith.constant 0 : i32
    %c0_i32_0 = arith.constant 0 : i32
    %c0_i32_1 = arith.constant 0 : i32
    return %c0_i32, %c0_i32_0 : i32, i32
  }
  func.func @transform_5(%arg0: i32) -> (i32, i32) {
    %c0_i32 = arith.constant 0 : i32
    %c0_i32_0 = arith.constant 0 : i32
    %c0_i32_1 = arith.constant 0 : i32
    return %c0_i32, %c0_i32_0 : i32, i32
  }
  func.func @transform_6(%arg0: i32) -> (i32, i32) {
    %c0_i32 = arith.constant 0 : i32
    %c0_i32_0 = arith.constant 0 : i32
    %c0_i32_1 = arith.constant 0 : i32
    return %c0_i32, %c0_i32_0 : i32, i32
  }
  func.func @transform_7(%arg0: i32) -> (i32, i32) {
    %c0_i32 = arith.constant 0 : i32
    %c0_i32_0 = arith.constant 0 : i32
    %c0_i32_1 = arith.constant 0 : i32
    return %c0_i32, %c0_i32_0 : i32, i32
  }
  func.func @transform_8(%arg0: i32) -> (i32, i32) {
    %c0_i32 = arith.constant 0 : i32
    %c0_i32_0 = arith.constant 0 : i32
    %c0_i32_1 = arith.constant 0 : i32
    return %c0_i32, %c0_i32_0 : i32, i32
  }
  func.func @transform_9(%arg0: i32) -> (i32, i32) {
    %c0_i32 = arith.constant 0 : i32
    %c0_i32_0 = arith.constant 0 : i32
    %c0_i32_1 = arith.constant 0 : i32
    return %c0_i32, %c0_i32_0 : i32, i32
  }
  func.func @transform_10(%arg0: i32) -> (i32, i32) {
    %c0_i32 = arith.constant 0 : i32
    %c0_i32_0 = arith.constant 0 : i32
    %c0_i32_1 = arith.constant 0 : i32
    return %c0_i32, %c0_i32_0 : i32, i32
  }
  func.func @transform_11(%arg0: i32) -> (i32, i32) {
    %c0_i32 = arith.constant 0 : i32
    %c0_i32_0 = arith.constant 0 : i32
    return %arg0, %c0_i32 : i32, i32
  }
}

</mosaic_0001>

<bundles_post_ra>
// kernel: tpu_custom_call.1
= control target key start
LH: loop header
LB: loop body
LE: loop exit
PB: predicated region body
PF: predicated region fallthrough
CT: control target
= control target key end

     0   :  { %s3569_s0 = inlined_call_operand.hbm [shape: f32[256,128], index: 0, kind: input, shape index: {}]   ;;  %s3570_s1 = inlined_call_operand.hbm [shape: bf16[128,128], index: 1, kind: input, shape index: {}]   ;;  %s3571_s2 = inlined_call_operand.vmem [shape: f32[1,128], index: 2, kind: input, shape index: {}]   ;;  %s3572_s3 = inlined_call_operand.hbm [shape: bf16[128,256], index: 3, kind: input, shape index: {}]   ;;  %s3573_s4 = inlined_call_operand.vmem [shape: f32[1,256], index: 4, kind: input, shape index: {}]   ;;  %s3574_s5 = inlined_call_operand.hbm [shape: bf16[256,128], index: 5, kind: input, shape index: {}]   ;;  %s3575_s6 = inlined_call_operand.vmem [shape: f32[1,128], index: 6, kind: input, shape index: {}]   ;;  %s3576_s7 = inlined_call_operand.hbm [shape: bf16[128,128], index: 7, kind: input, shape index: {}]   ;;  %s3577_s8 = inlined_call_operand.vmem [shape: f32[1,128], index: 8, kind: input, shape index: {}]   ;;  %s3578_s9 = inlined_call_operand.hbm [shape: bf16[128,128], index: 9, kind: input, shape index: {}]   ;;  %s3579_s10 = inlined_call_operand.vmem [shape: f32[1,128], index: 10, kind: input, shape index: {}]   ;;  %s3580_s11 = inlined_call_operand.vmem [shape: f32[256,10], index: 11, kind: output, shape index: {}]  }
   0x1   :  { %3589 = sst [smem:[#allocation16_spill]] %s3570_s1 }
   0x2   :  { %3590 = sst [smem:[#allocation17_spill]] %s3574_s5 }
   0x3   :  { %3591 = sst [smem:[#allocation18_spill]] %s3577_s8 }
   0x4   :  { %3592 = sst [smem:[#allocation19_spill]] %s3579_s10 }
   0x5   :  { %3593 = sst [smem:[#allocation20_spill]] %s3580_s11 }
   0x6   :  { %16 = vsyncpa [#allocation3], 0 }
   0x7   :  { %18 = vsyncpa [#allocation3 + $0x1], 0 }
   0x8   :  { %19 = vsyncpa [#allocation5], 0 }
   0x9   :  { %20 = vsyncpa [#allocation8], 0 }
   0xa   :  { %21 = vsyncpa [#allocation11], 0  ;;  %s2907_s17 = smov 0   ;;  %s2909_s18 = smov 0  }
   0xb   :  { %s2911_s19 = smov 0   ;;  %s2913_s20 = smov 0  }
   0xc LB: > { %s2836_s21 = smov [#allocation4]   ;;  %s3581_s23 = sadd.s32 4294967295, %s2834_s20   ;;  %s2834_s20 = sphi %s2913_s20, %s3614_s20   ;;  %s2830_s19 = sphi %s2911_s19, %s3613_s19   ;;  %s2826_s18 = sphi %s2909_s18, %s3612_s18   ;;  %s2822_s17 = sphi %s2907_s17, %s3611_s17  }
   0xd   : > { %s306_s22 = sshll.u32 %s2836_s21, 4  ;;  %p2009_p0 = scmp.ge.s32.totalorder %s2834_s20, 1  ;;  %s2936_s22 = int_to_ptr.vmem [resolvable:$true] %s306_s22 }
   0xe   : > { %p2931_p1 = scmp.eq.s32.totalorder %s3581_s23, 0  ;;  %p294_p2 = scmp.lt.s32.totalorder %s2834_s20, 3 }
   0xf   : > { %s2837_s26 = smov [#allocation7]   ;;  %s2838_s29 = smov [#allocation6]  }
  0x10   : > { %s3594_s24 = scalar_select %p2931_p1, 1, 0 }
  0x11   : > { %p2938_p3 = pnand %p2009_p0, %p294_p2  ;;  %s338_s27 = sshll.u32 %s2837_s26, 4  ;;  %s2950_s27 = int_to_ptr.vmem [resolvable:$true] %s338_s27 }
  0x12   : > { %s322_s30 = sshll.u32 %s2838_s29, 4  ;;  %s3597_s1 = sld [smem:[#allocation16_spill]]  ;;  %s2952_s30 = int_to_ptr.vmem [resolvable:$true] %s322_s30 }
  0x13   : > { %s3595_s25 = scalar_select %p2938_p3, 1, 0 }
  0x14   : > { %p2353_p4 = pneg %p2938_p3 }
  0x16   : > { %p2946_p5 = pnand %p2353_p4, %p2931_p1 }
  0x18   : > { %s2618_s14 = scalar_lea.hbm %s3597_s1, 1024  ;;  %p2962_p7 = pneg %p2946_p5 }
  0x19   : > { %p2619_p6 = scmp.ne.s32.totalorder %s3597_s1, %s2618_s14  ;;  %p2625_p10 = scmp.lt.u32.totalorder %s2618_s14, %s3597_s1 }
  0x1b   : > { %p2621_p8 = pnand %p2962_p7, %p2619_p6 }
  0x1d   : > { %p2622_p9 = pneg %p2621_p8 }
  0x1f   : > { %p2627_p11 = pnand %p2625_p10, %p2622_p9 }
  0x21   : > { %2630 = shalt.err (!%p2627_p11)
}
  0x22   : > { %s2631_s12 = scalar_lea.vmem %s2936_s22, 1024  ;;  %p2639_p2 = scmp.lt.s32.totalorder %s2936_s22, %s2936_s22 }
  0x23   : > { %p2632_p12 = scmp.ne.s32.totalorder %s2936_s22, %s2631_s12  ;;  %p2640_p4 = scmp.lt.s32.totalorder %s2631_s12, %s2631_s12 }
  0x25   : > { %p2634_p13 = pnand %p2632_p12, %p2962_p7  ;;  %p2641_p6 = por %p2640_p4, %p2639_p2 }
  0x27   : > { %p2635_p0 = pneg %p2634_p13 }
  0x29   : > { %p2642_p8 = pnand %p2641_p6, %p2635_p0 }
  0x2b   : > { %2645 = shalt.err (!%p2642_p8)
}
  0x2c   : > { %s3582_s13 = smov 64   ;;  %s3584_s14 = smov 4  }
  0x2d   : > { %2356 = dma.hbm_to_vmem [thread:$0]  (!%p2946_p5), %s3597_s1, 1024, %s2936_s22, [#allocation5], %s3582_s13, %s3582_s13, %s3584_s14  }
  0x2e   : > { %s3599_s5 = sld [smem:[#allocation17_spill]] }
  0x34   : > { %s2646_s12 = scalar_lea.hbm %s3599_s5, 2048 }
  0x35   : > { %p2647_p9 = scmp.ne.s32.totalorder %s3599_s5, %s2646_s12  ;;  %p2653_p12 = scmp.lt.u32.totalorder %s2646_s12, %s3599_s5 }
  0x37   : > { %p2649_p10 = pnand %p2647_p9, %p2962_p7 }
  0x39   : > { %p2650_p11 = pneg %p2649_p10 }
  0x3b   : > { %p2655_p13 = pnand %p2653_p12, %p2650_p11 }
  0x3d   : > { %2658 = shalt.err (!%p2655_p13)
}
  0x3e   : > { %s2659_s22 = scalar_lea.vmem %s2950_s27, 2048  ;;  %p2667_p6 = scmp.lt.s32.totalorder %s2950_s27, %s2950_s27 }
  0x3f   : > { %p2660_p0 = scmp.ne.s32.totalorder %s2950_s27, %s2659_s22  ;;  %p2668_p8 = scmp.lt.s32.totalorder %s2659_s22, %s2659_s22 }
  0x41   : > { %p2662_p2 = pnand %p2660_p0, %p2962_p7  ;;  %p2669_p9 = por %p2668_p8, %p2667_p6 }
  0x43   : > { %p2663_p4 = pneg %p2662_p2 }
  0x45   : > { %p2670_p10 = pnand %p2669_p9, %p2663_p4 }
  0x47   : > { %2673 = shalt.err (!%p2670_p10)
}
  0x48   : > { %2362 = dma.hbm_to_vmem [thread:$0]  (!%p2946_p5), %s3599_s5, 2048, %s2950_s27, [#allocation8], %s3582_s13, %s3582_s13, %s3584_s14  }
  0x49   : > { %s2674_s15 = scalar_lea.hbm %s3572_s3, 2048 }
  0x4a   : > { %p2675_p11 = scmp.ne.s32.totalorder %s3572_s3, %s2674_s15  ;;  %p2681_p0 = scmp.lt.u32.totalorder %s2674_s15, %s3572_s3 }
  0x4c   : > { %p2677_p12 = pnand %p2675_p11, %p2962_p7 }
  0x4e   : > { %p2678_p13 = pneg %p2677_p12 }
  0x50   : > { %p2683_p2 = pnand %p2681_p0, %p2678_p13 }
  0x52   : > { %2686 = shalt.err (!%p2683_p2)
}
  0x53   : > { %s2687_s27 = scalar_lea.vmem %s2952_s30, 2048  ;;  %p2695_p9 = scmp.lt.s32.totalorder %s2952_s30, %s2952_s30 }
  0x54   : > { %p2688_p4 = scmp.ne.s32.totalorder %s2952_s30, %s2687_s27  ;;  %p2696_p10 = scmp.lt.s32.totalorder %s2687_s27, %s2687_s27 }
  0x56   : > { %p2690_p6 = pnand %p2688_p4, %p2962_p7  ;;  %p2697_p11 = por %p2696_p10, %p2695_p9 }
  0x58   : > { %p2691_p8 = pneg %p2690_p6 }
  0x5a   : > { %p2698_p12 = pnand %p2697_p11, %p2691_p8 }
  0x5c   : > { %2701 = shalt.err (!%p2698_p12)
}
  0x5d   : > { %s2841_s22 = smov 128   ;;  %s2842_s8 = smov 8  }
  0x5e   : > { %2359 = dma.hbm_to_vmem [thread:$0]  (!%p2946_p5), %s3572_s3, 2048, %s2952_s30, [#allocation5], %s2841_s22, %s2841_s22, %s2842_s8  }
  0x5f   : > { %s2843_s23 = smov [#allocation9]   ;;  %s2844_s16 = smov [#allocation10]  }
  0x60   : > { %s354_s15 = sshll.u32 %s2843_s23, 4  ;;  %s370_s26 = sshll.u32 %s2844_s16, 4  ;;  %s355_s15 = int_to_ptr.vmem [resolvable:$true] %s354_s15  ;;  %s371_s26 = int_to_ptr.vmem [resolvable:$true] %s370_s26 }
  0x61   : > { %s2702_s27 = scalar_lea.hbm %s3576_s7, 1024 }
  0x62   : > { %p2703_p13 = scmp.ne.s32.totalorder %s3576_s7, %s2702_s27  ;;  %p2709_p4 = scmp.lt.u32.totalorder %s2702_s27, %s3576_s7 }
  0x64   : > { %p2705_p0 = pnand %p2703_p13, %p2962_p7 }
  0x66   : > { %p2706_p2 = pneg %p2705_p0 }
  0x68   : > { %p2711_p6 = pnand %p2709_p4, %p2706_p2 }
  0x6a   : > { %2714 = shalt.err (!%p2711_p6)
}
  0x6b   : > { %s2715_s30 = scalar_lea.vmem %s355_s15, 1024  ;;  %p2723_p11 = scmp.lt.s32.totalorder %s355_s15, %s355_s15 }
  0x6c   : > { %p2716_p8 = scmp.ne.s32.totalorder %s355_s15, %s2715_s30  ;;  %p2724_p12 = scmp.lt.s32.totalorder %s2715_s30, %s2715_s30 }
  0x6e   : > { %p2718_p9 = pnand %p2716_p8, %p2962_p7  ;;  %p2725_p3 = por %p2724_p12, %p2723_p11 }
  0x70   : > { %p2719_p10 = pneg %p2718_p9 }
  0x72   : > { %p2726_p1 = pnand %p2725_p3, %p2719_p10 }
  0x74   : > { %2729 = shalt.err (!%p2726_p1)
}
  0x75   : > { %s3600_s13 = smov 4   ;;  %s3601_s14 = smov 64  }
  0x76   : > { %2365 = dma.hbm_to_vmem [thread:$0]  (!%p2946_p5), %s3576_s7, 1024, %s355_s15, [#allocation8], %s3601_s14, %s3601_s14, %s3600_s13  }
  0x77   : > { %s2730_s23 = scalar_lea.hbm %s3578_s9, 1024 }
  0x78   : > { %p2731_p3 = scmp.ne.s32.totalorder %s3578_s9, %s2730_s23  ;;  %p2737_p0 = scmp.lt.u32.totalorder %s2730_s23, %s3578_s9 }
  0x7a   : > { %p2733_p1 = pnand %p2731_p3, %p2962_p7 }
  0x7c   : > { %p2734_p13 = pneg %p2733_p1 }
  0x7e   : > { %p2739_p2 = pnand %p2737_p0, %p2734_p13 }
  0x80   : > { %2742 = shalt.err (!%p2739_p2)
}
  0x81   : > { %s2743_s30 = scalar_lea.vmem %s371_s26, 1024  ;;  %p2751_p9 = scmp.lt.s32.totalorder %s371_s26, %s371_s26 }
  0x82   : > { %p2744_p4 = scmp.ne.s32.totalorder %s371_s26, %s2743_s30  ;;  %p2752_p10 = scmp.lt.s32.totalorder %s2743_s30, %s2743_s30 }
  0x84   : > { %p2746_p6 = pnand %p2744_p4, %p2962_p7  ;;  %p2753_p11 = por %p2752_p10, %p2751_p9 }
  0x86   : > { %p2747_p8 = pneg %p2746_p6 }
  0x88   : > { %p2754_p12 = pnand %p2753_p11, %p2747_p8 }
  0x8a   : > { %2757 = shalt.err (!%p2754_p12)
}
  0x8b   : > { %2368 = dma.hbm_to_vmem [thread:$0]  (!%p2946_p5), %s3578_s9, 1024, %s371_s26, [#allocation11], %s3601_s14, %s3601_s14, %s3600_s13  }
  0x8c   : > { %s3081_s28 = sadd.s32 1, %s2834_s20   ;;  %s34_s5 = sadd.s32 1, %s2830_s19 }
  0x8d   : > { %s31_s21 = ssub.s32 %s2834_s20, %s3081_s28  ;;  %p41_p3 = scmp.ne.s32.totalorder %s2830_s19, %s2826_s18 }
  0x8e   : > { %p32_p7 = scmp.eq.s32.totalorder %s31_s21, 0  ;;  %p42_p1 = scmp.eq.s32.totalorder %s2834_s20, 0 }
  0x8f   : > { %p47_p13 = scmp.ne.s32.totalorder %s2826_s18, %s2822_s17  ;;  %p3602_p2 = scmp.ne.s32.totalorder %s3594_s24, 0 }
  0x90   : > { %s3092_s10 = scalar_select %p32_p7, %s2830_s19, %s34_s5  }
  0x91   : > { %p43_p0 = por %p42_p1, %p41_p3  ;;  %p3096_p4 = por %p3602_p2, %p47_p13 }
  0x92   : > { %p2378_p6 = scmp.lt.s32.totalorder %s2834_s20, 2  ;;  %s387_s23 = sand.u32 1, %s2830_s19  }
  0x93   : > { %s2016_s26 = sshll.u32 %s387_s23, 7  ;;  %s2106_s13 = sshll.u32 %s2834_s20, 11 }
  0x94   : > { %s3106_s29 = scalar_lea.hbm %s3569_s0, %s2106_s13  ;;  %s391_s17 = scalar_lea.vmem [#allocation2], %s2016_s26 }
  0x95   : > { %s398_s12 = sshll.u32 %s391_s17, 4  ;;  %p3110_p5 = pnand %p2378_p6, %p43_p0  ;;  %s3108_s12 = int_to_ptr.vmem [resolvable:$true] %s398_s12 }
  0x96   : > { %s3114_s30 = scalar_lea.sflag [#allocation3], %s387_s23  ;;  %s2758_s15 = scalar_lea.hbm %s3106_s29, 2048 }
  0x97   : > { %p2759_p8 = scmp.ne.s32.totalorder %s3106_s29, %s2758_s15  ;;  %p2760_p9 = pneg %p3110_p5 }
  0x98   : > { %s2763_s5 = scalar_lea.hbm %s3569_s0, 4096  ;;  %p2764_p12 = scmp.lt.u32.totalorder %s3106_s29, %s3569_s0 }
  0x99   : > { %p2761_p10 = pnand %p2760_p9, %p2759_p8  ;;  %p2765_p7 = scmp.lt.u32.totalorder %s2763_s5, %s2758_s15 }
  0x9a   : > { %p2767_p1 = scmp.lt.u32.totalorder %s2758_s15, %s3106_s29 }
  0x9b   : > { %p2762_p11 = pneg %p2761_p10  ;;  %p2766_p3 = por %p2765_p7, %p2764_p12 }
  0x9d   : > { %p2768_p13 = por %p2767_p1, %p2766_p3 }
  0x9f   : > { %p2769_p0 = pnand %p2768_p13, %p2762_p11 }
  0xa1   : > { %2772 = shalt.err (!%p2769_p0)
}
  0xa2   : > { %s2773_s23 = scalar_lea.vmem %s3108_s12, 2048  ;;  %s2845_s14 = smov [#allocation2]  }
  0xa3   : > { %p2774_p2 = scmp.ne.s32.totalorder %s3108_s12, %s2773_s23  ;;  %s2778_s16 = sshll.u32 %s2845_s14, 4  ;;  %s2779_s16 = int_to_ptr.vmem [resolvable:$false] %s2778_s16 }
  0xa4   : > { %s2780_s17 = scalar_lea.vmem %s2779_s16, 4096  ;;  %p2781_p10 = scmp.lt.s32.totalorder %s3108_s12, %s2779_s16 }
  0xa5   : > { %p2776_p6 = pnand %p2774_p2, %p2760_p9  ;;  %p2782_p12 = scmp.lt.s32.totalorder %s2780_s17, %s2773_s23 }
  0xa7   : > { %p2777_p8 = pneg %p2776_p6  ;;  %p2783_p7 = por %p2782_p12, %p2781_p10 }
  0xa9   : > { %p2784_p3 = pnand %p2783_p7, %p2777_p8 }
  0xab   : > { %2787 = shalt.err (!%p2784_p3)
}
  0xac   : > { %2372 = dma.hbm_to_vmem [thread:$0]  (!%p3110_p5), %s3106_s29, 2048, %s3108_s12, %s3114_s30, %s2841_s22, %s2841_s22, %s2842_s8  }
  0xad   : > { %p3605_p9 = scmp.ne.s32.totalorder %s3595_s25, 0 }
  0xae   : > { %s412_s15 = sand.u32 (!%p3605_p9), 1, %s2826_s18  }
  0xaf   : > { %410 = sbr.rel (%p3605_p9) target bundleno = 1735 (0x6c7), region = 64  ;;  %s2020_s1 = sshll.u32 (!%p3605_p9), %s412_s15, 7 }
  0xb0   : > { %s413_s21 = scalar_lea.sflag (!%p3605_p9), [#allocation3], %s412_s15  ;;  %s3148_s5 = scalar_lea.vmem (!%p3605_p9), [#allocation2], %s2020_s1 }
  0xb6   : > { %2805 = dma.done.wait (%p3096_p4), %s413_s21, 2048  }
  0xb7   : > { %2807 = vsyncadd (%p3096_p4), %s413_s21, 4294965248  ;;  %p3606_p11 = scmp.ne.s32.totalorder %s3594_s24, 0 }
  0xb9   : > { %2809 = dma.done.wait (%p3606_p11), [#allocation5], 3072  }
  0xba   : > { %2811 = vsyncadd (%p3606_p11), [#allocation5], 4294964224 }
  0xbb   : > { %2813 = dma.done.wait (%p3606_p11), [#allocation8], 3072  }
  0xbc   : > { %2815 = vsyncadd (%p3606_p11), [#allocation8], 4294964224 }
  0xbd   : > { %2817 = dma.done.wait (%p3606_p11), [#allocation11], 1024  }
  0xbe   : > { %2819 = vsyncadd (%p3606_p11), [#allocation11], 4294966272  ;;  %v2426_v0 = vld [vmem:[#allocation4] sm:$0xff]   ;;  %v2427_v1 = vld [vmem:[#allocation4 + $0x8] sm:$0xff]   ;;  %v2846_v48 = vmov 0   ;;  %s3607_s30 = sld [smem:[#allocation18_spill]] }
  0xbf   : > { %2219 = vmatprep.subr.bf16.mxu0 %v2426_v0  ;;  %v2428_v2 = vld [vmem:[#allocation4 + $0x10] sm:$0xff]   ;;  %v2429_v3 = vld [vmem:[#allocation4 + $0x18] sm:$0xff]   ;;  %v483_v4 = vld [vmem:[%s3148_s5] sm:$0xff]  ;;  %839 = vmatprep.mubr.bf16.mxu1 %v2846_v48  ;;  %s3608_s23 = sld [smem:[#allocation19_spill]]  ;;  %s3609_s14 = sadd.s32 4294967295, %s2834_s20   ;;  %vm1875_vm1 = vcmask 80896  }
  0xc0   : > { %2220 = vmatpush3.bf16.msra.mxu0 %v2426_v0  ;;  %v484_v5 = vld [vmem:[%s3148_s5 + $0x8] sm:$0xff]  ;;  %v2430_v7 = vld [vmem:[#allocation4 + $0x20] sm:$0xff]   ;;  %v2437_v10 = vld [vmem:[#allocation6 + $0x14] ss:$8 sps:$4 sm:$0xff]   ;;  %s2026_s16 = sshll.u32 %s3609_s14, 4  ;;  %s3610_s21 = sld [smem:[#allocation20_spill]] }
  0xc1   : > { %2221 = vmatprep.subr.bf16.mxu0 %v2427_v1  ;;  %v499_v6 = vpack.c.bf16 %v484_v5, %v483_v4  ;;  %v2434_v8 = vld [vmem:[#allocation6 + $0x4] ss:$8 sps:$4 sm:$0xff]   ;;  %v2436_v9 = vld [vmem:[#allocation6] ss:$8 sps:$4 sm:$0xff]   ;;  %v2439_v12 = vld [vmem:[#allocation6 + $0x10] ss:$8 sps:$4 sm:$0xff]  }
  0xc2   : > { %v2431_v11 = vld [vmem:[#allocation4 + $0x28] sm:$0xff]   ;;  %807 = vmatprep.subr.bf16.mxu1 %v2434_v8  ;;  %v2432_v14 = vld [vmem:[#allocation4 + $0x30] sm:$0xff]   ;;  %v2433_v17 = vld [vmem:[#allocation4 + $0x38] sm:$0xff]   ;;  %p477_p4 = scmp.lt.s32.totalorder %s2026_s16, 31 }
  0xc3   : > { %2235 = vmatprep.mubr.bf16.mxu0 %v499_v6  ;;  %808 = vmatpush1.bf16.msra.mxu1 %v2436_v9  ;;  %v2440_v13 = vld [vmem:[#allocation6 + $0x24] ss:$8 sps:$4 sm:$0xff]   ;;  %v2442_v15 = vld [vmem:[#allocation6 + $0x20] ss:$8 sps:$4 sm:$0xff]   ;;  %v2443_v16 = vld [vmem:[#allocation6 + $0x34] ss:$8 sps:$4 sm:$0xff]  }
  0xc4   : > { %2222 = vmatpush3.bf16.msra.mxu0 %v2427_v1  ;;  %809 = vmatprep.subr.bf16.mxu1 %v2437_v10  ;;  %v2445_v18 = vld [vmem:[#allocation6 + $0x30] ss:$8 sps:$4 sm:$0xff]   ;;  %v2446_v19 = vld [vmem:[#allocation6 + $0x44] ss:$8 sps:$4 sm:$0xff]   ;;  %v2448_v24 = vld [vmem:[#allocation6 + $0x40] ss:$8 sps:$4 sm:$0xff]  }
  0xc5   : > { %2223 = vmatprep.subr.bf16.mxu0 %v2428_v2  ;;  %v485_v20 = vld [vmem:[%s3148_s5 + $0x10] sm:$0xff]  ;;  %v486_v21 = vld [vmem:[%s3148_s5 + $0x18] sm:$0xff]  ;;  %v487_v22 = vld [vmem:[%s3148_s5 + $0x20] sm:$0xff]  ;;  %s3616_s16 = smov (!%p477_p4, %s2026_s16), 31 }
  0xc6   : > { %v488_v23 = vld [vmem:[%s3148_s5 + $0x28] sm:$0xff]  ;;  %v2449_v25 = vld [vmem:[#allocation6 + $0x54] ss:$8 sps:$4 sm:$0xff]   ;;  %v500_v26 = vpack.c.bf16 %v486_v21, %v485_v20  ;;  %v2451_v28 = vld [vmem:[#allocation6 + $0x50] ss:$8 sps:$4 sm:$0xff]   ;;  %s2027_s17 = sshll.u32 %s3616_s16, 3 }
  0xc7   : > { %810 = vmatpush1.bf16.msra.mxu1 %v2439_v12  ;;  %v501_v27 = vpack.c.bf16 %v488_v23, %v487_v22  ;;  %v489_v29 = vld [vmem:[%s3148_s5 + $0x30] sm:$0xff]  ;;  %v490_v30 = vld [vmem:[%s3148_s5 + $0x38] sm:$0xff]  ;;  %v491_v31 = vld [vmem:[%s3148_s5 + $0x40] sm:$0xff] }
  0xc8   : > { %2224 = vmatpush3.bf16.msra.mxu0 %v2428_v2  ;;  %811 = vmatprep.subr.bf16.mxu1 %v2440_v13  ;;  %v492_v32 = vld [vmem:[%s3148_s5 + $0x48] sm:$0xff]  ;;  %v502_v33 = vpack.c.bf16 %v490_v30, %v489_v29  ;;  %v493_v35 = vld [vmem:[%s3148_s5 + $0x50] sm:$0xff]  ;;  %v494_v36 = vld [vmem:[%s3148_s5 + $0x58] sm:$0xff] }
  0xc9   : > { %2225 = vmatprep.subr.bf16.mxu0 %v2429_v3  ;;  %v503_v34 = vpack.c.bf16 %v492_v32, %v491_v31  ;;  %v495_v37 = vld [vmem:[%s3148_s5 + $0x60] sm:$0xff]  ;;  %v496_v38 = vld [vmem:[%s3148_s5 + $0x68] sm:$0xff]  ;;  %v504_v39 = vpack.c.bf16 %v494_v36, %v493_v35  ;;  %v497_v41 = vld [vmem:[%s3148_s5 + $0x70] sm:$0xff] }
  0xca   : > { %v505_v40 = vpack.c.bf16 %v496_v38, %v495_v37  ;;  %v498_v42 = vld [vmem:[%s3148_s5 + $0x78] sm:$0xff]  ;;  %v2452_v44 = vld [vmem:[#allocation6 + $0x64] ss:$8 sps:$4 sm:$0xff]   ;;  %v2454_v45 = vld [vmem:[#allocation6 + $0x60] ss:$8 sps:$4 sm:$0xff]   ;;  %s3506_s5 = scalar_lea.vmem %s3610_s21, %s2027_s17 }
  0xcb   : > { %812 = vmatpush1.bf16.msra.mxu1 %v2442_v15  ;;  %v506_v43 = vpack.c.bf16 %v498_v42, %v497_v41  ;;  %v2455_v46 = vld [vmem:[#allocation6 + $0x74] ss:$8 sps:$4 sm:$0xff]   ;;  %v2457_v47 = vld [vmem:[#allocation6 + $0x70] ss:$8 sps:$4 sm:$0xff]   ;;  %v2458_v49 = vld [vmem:[#allocation7 + $0x40] sm:$0xff]  }
  0xcc   : > { %2226 = vmatpush3.bf16.msra.mxu0 %v2429_v3  ;;  %813 = vmatprep.subr.bf16.mxu1 %v2443_v16  ;;  %v2459_v50 = vld [vmem:[#allocation7] sm:$0xff]   ;;  %v2460_v51 = vld [vmem:[#allocation7 + $0x48] sm:$0xff]   ;;  %v2462_v53 = vld [vmem:[#allocation7 + $0x50] sm:$0xff]  }
  0xcd   : > { %2227 = vmatprep.subr.bf16.mxu0 %v2430_v7  ;;  %v2461_v52 = vld [vmem:[#allocation7 + $0x8] sm:$0xff]   ;;  %v2463_v54 = vld [vmem:[#allocation7 + $0x10] sm:$0xff]   ;;  %v2464_v55 = vld [vmem:[#allocation7 + $0x58] sm:$0xff]  }
  0xce   : > { %v2465_v56 = vld [vmem:[#allocation7 + $0x18] sm:$0xff]   ;;  %v2466_v57 = vld [vmem:[#allocation7 + $0x60] sm:$0xff]   ;;  %v2468_v59 = vld [vmem:[#allocation7 + $0x68] sm:$0xff]  }
  0xcf   : > { %814 = vmatpush1.bf16.msra.mxu1 %v2445_v18  ;;  %v2467_v58 = vld [vmem:[#allocation7 + $0x20] sm:$0xff]   ;;  %v2469_v60 = vld [vmem:[#allocation7 + $0x28] sm:$0xff]  }
  0xd0   : > { %2228 = vmatpush3.bf16.msra.mxu0 %v2430_v7  ;;  %815 = vmatprep.subr.bf16.mxu1 %v2446_v19  ;;  %v2028_v61 = vld [vmem:[%s3571_s2] ss:$0 sm:$0xff] }
  0xd1   : > { %2229 = vmatprep.subr.bf16.mxu0 %v2431_v11 }
  0xd3   : > { %816 = vmatpush1.bf16.msra.mxu1 %v2448_v24 }
  0xd4   : > { %2230 = vmatpush3.bf16.msra.mxu0 %v2431_v11  ;;  %817 = vmatprep.subr.bf16.mxu1 %v2449_v25 }
  0xd5   : > { %2231 = vmatprep.subr.bf16.mxu0 %v2432_v14 }
  0xd7   : > { %818 = vmatpush1.bf16.msra.mxu1 %v2451_v28 }
  0xd8   : > { %2232 = vmatpush3.bf16.msra.mxu0 %v2432_v14  ;;  %819 = vmatprep.subr.bf16.mxu1 %v2452_v44 }
  0xd9   : > { %2233 = vmatprep.subr.bf16.mxu0 %v2433_v17 }
  0xdb   : > { %820 = vmatpush1.bf16.msra.mxu1 %v2454_v45 }
  0xdc   : > { %2234 = vmatpush3.bf16.msra.mxu0 %v2433_v17  ;;  %821 = vmatprep.subr.bf16.mxu1 %v2455_v46 }
  0xdd   : > { %2123 = vmatprep.subr.bf16.mxu0 %v2458_v49 }
  0xdf   : > { %2236 = vmatmul.mubr.bf16.vlgmr.msra.gmra.mrb[0].mxu0 %v500_v26  ;;  %822 = vmatpush1.bf16.msra.mxu1 %v2457_v47 }
  0xe0   : > { %2239 = vmatprep.mubr.bf16.mxu0 %v501_v27  ;;  %2124 = vmatpush3.bf16.msra.mxu0 %v2459_v50 }
  0xe1   : > { %2125 = vmatprep.subr.bf16.mxu0 %v2460_v51 }
  0xe4   : > { %2126 = vmatpush3.bf16.msra.mxu0 %v2461_v52 }
  0xe5   : > { %2127 = vmatprep.subr.bf16.mxu0 %v2462_v53 }
  0xe7   : > { %2240 = vmatmul.mubr.bf16.gmra.mrb[4].mxu0 %v502_v33 }
  0xe8   : > { %2243 = vmatprep.mubr.bf16.mxu0 %v503_v34  ;;  %2128 = vmatpush3.bf16.msra.mxu0 %v2463_v54 }
  0xe9   : > { %2129 = vmatprep.subr.bf16.mxu0 %v2464_v55  ;;  %v2470_v55 = vld [vmem:[#allocation7 + $0x70] sm:$0xff]  }
  0xec   : > { %2130 = vmatpush3.bf16.msra.mxu0 %v2465_v56  ;;  %v2471_v56 = vld [vmem:[#allocation7 + $0x30] sm:$0xff]  }
  0xed   : > { %2131 = vmatprep.subr.bf16.mxu0 %v2466_v57  ;;  %v2472_v57 = vld [vmem:[#allocation7 + $0x78] sm:$0xff]  }
  0xef   : > { %2244 = vmatmul.mubr.bf16.gmra.mrb[8].mxu0 %v504_v39 }
  0xf0   : > { %2247 = vmatprep.mubr.bf16.mxu0 %v505_v40  ;;  %2132 = vmatpush3.bf16.msra.mxu0 %v2467_v58  ;;  %v2473_v58 = vld [vmem:[#allocation7 + $0x38] sm:$0xff]  }
  0xf1   : > { %2133 = vmatprep.subr.bf16.mxu0 %v2468_v59  ;;  %v2474_v59 = vld [vmem:[#allocation9] sm:$0xff]  }
  0xf2   : > { %2251 = vmatprep.subr.bf16.mxu1 %v2474_v59 }
  0xf4   : > { %2134 = vmatpush3.bf16.msra.mxu0 %v2469_v60  ;;  %v2475_v60 = vld [vmem:[#allocation9 + $0x8] sm:$0xff]  }
  0xf5   : > { %2135 = vmatprep.subr.bf16.mxu0 %v2470_v55 }
  0xf7   : > { %2248 = vmatmul.mubr.bf16.gmra.mrb[12].mxu0 %v506_v43 }
  0xf8   : > { %2136 = vmatpush3.bf16.msra.mxu0 %v2471_v56 }
  0xf9   : > { %2137 = vmatprep.subr.bf16.mxu0 %v2472_v57 }
  0xfc   : > { %2138 = vmatpush3.bf16.msra.mxu0 %v2473_v58 }
 0x1b2   : > { %v2237_v62 = vpop.f32.mrb[0].mxu0 }
 0x1b3   : > { %v621_v63 = vadd.f32 %v2237_v62, %v2028_v61  ;;  %v612_v0 = vpop.f32.mrb[1].mxu0  ;;  %v2477_v62 = vld [vmem:[#allocation9 + $0x18] sm:$0xff]  }
 0x1b4   : > { %v613_v1 = vadd.f32 %v2028_v61, %v612_v0  ;;  %v2238_v2 = vpop.f32.mrb[2].mxu0 }
 0x1b5   : > { %v624_v3 = vadd.f32 %v2238_v2, %v2028_v61  ;;  %v615_v4 = vpop.f32.mrb[3].mxu0  ;;  %v677_v6 = vmax.f32 %v621_v63, 0.0 }
 0x1b6   : > { %v616_v5 = vadd.f32 %v2028_v61, %v615_v4  ;;  %v675_v8 = vmax.f32 %v613_v1, 0.0  ;;  %v715_v1 = vld [vmem:[%s3573_s4] sm:$0x3] }
 0x1b7   : > { %v678_v7 = vmax.f32 %v624_v3, 0.0 }
 0x1b8   : > { %v676_v9 = vmax.f32 %v616_v5, 0.0 }
 0x1b9   : > { %v692_v10 = vpack.c.bf16 %v678_v7, %v677_v6 }
 0x1ba   : > { %v691_v11 = vpack.c.bf16 %v676_v9, %v675_v8  ;;  %v2241_v12 = vpop.f32.mrb[4].mxu0 }
 0x1bb   : > { %v637_v13 = vadd.f32 %v2241_v12, %v2028_v61  ;;  %v628_v14 = vpop.f32.mrb[5].mxu0 }
 0x1bc   : > { %840 = vmatmul.mubr.bf16.vlgmr.msra.gmra.mrb[0].mxu1 %v691_v11  ;;  %v629_v15 = vadd.f32 %v2028_v61, %v628_v14  ;;  %v2242_v16 = vpop.f32.mrb[6].mxu0 }
 0x1bd   : > { %v681_v17 = vmax.f32 %v637_v13, 0.0  ;;  %v640_v18 = vadd.f32 %v2242_v16, %v2028_v61  ;;  %v631_v19 = vpop.f32.mrb[7].mxu0  ;;  %849 = vmatprep.mubr.bf16.mxu1 %v2846_v48  ;;  %2252 = vmatpush3.bf16.msra.mxu1 %v2474_v59 }
 0x1be   : > { %v679_v20 = vmax.f32 %v629_v15, 0.0  ;;  %v632_v21 = vadd.f32 %v2028_v61, %v631_v19  ;;  %2253 = vmatprep.subr.bf16.mxu1 %v2475_v60 }
 0x1bf   : > { %v682_v22 = vmax.f32 %v640_v18, 0.0 }
 0x1c0   : > { %v680_v23 = vmax.f32 %v632_v21, 0.0 }
 0x1c1   : > { %v694_v24 = vpack.c.bf16 %v682_v22, %v681_v17  ;;  %2254 = vmatpush3.bf16.msra.mxu1 %v2475_v60 }
 0x1c2   : > { %v693_v25 = vpack.c.bf16 %v680_v23, %v679_v20  ;;  %v2245_v26 = vpop.f32.mrb[8].mxu0 }
 0x1c3   : > { %v653_v27 = vadd.f32 %v2245_v26, %v2028_v61  ;;  %v644_v28 = vpop.f32.mrb[9].mxu0 }
 0x1c4   : > { %850 = vmatmul.mubr.bf16.gmra.mrb[4].mxu1 %v692_v10  ;;  %v645_v29 = vadd.f32 %v2028_v61, %v644_v28  ;;  %v2246_v30 = vpop.f32.mrb[10].mxu0 }
 0x1c5   : > { %859 = vmatprep.mubr.bf16.mxu1 %v2846_v48  ;;  %v685_v31 = vmax.f32 %v653_v27, 0.0  ;;  %v656_v32 = vadd.f32 %v2246_v30, %v2028_v61  ;;  %v647_v33 = vpop.f32.mrb[11].mxu0 }
 0x1c6   : > { %v683_v34 = vmax.f32 %v645_v29, 0.0  ;;  %v648_v35 = vadd.f32 %v2028_v61, %v647_v33 }
 0x1c7   : > { %v686_v36 = vmax.f32 %v656_v32, 0.0 }
 0x1c8   : > { %v684_v37 = vmax.f32 %v648_v35, 0.0 }
 0x1c9   : > { %v696_v38 = vpack.c.bf16 %v686_v36, %v685_v31 }
 0x1ca   : > { %v695_v39 = vpack.c.bf16 %v684_v37, %v683_v34  ;;  %v2249_v40 = vpop.f32.mrb[12].mxu0 }
 0x1cb   : > { %v669_v41 = vadd.f32 %v2249_v40, %v2028_v61  ;;  %v660_v42 = vpop.f32.mrb[13].mxu0 }
 0x1cc   : > { %860 = vmatmul.mubr.bf16.gmra.mrb[8].mxu1 %v693_v25  ;;  %v661_v43 = vadd.f32 %v2028_v61, %v660_v42  ;;  %v2250_v44 = vpop.f32.mrb[14].mxu0 }
 0x1cd   : > { %869 = vmatprep.mubr.bf16.mxu1 %v2846_v48  ;;  %v689_v45 = vmax.f32 %v669_v41, 0.0  ;;  %v672_v46 = vadd.f32 %v2250_v44, %v2028_v61  ;;  %v663_v47 = vpop.f32.mrb[15].mxu0 }
 0x1ce   : > { %v687_v49 = vmax.f32 %v661_v43, 0.0  ;;  %v664_v50 = vadd.f32 %v2028_v61, %v663_v47  ;;  %v2476_v61 = vld [vmem:[#allocation9 + $0x10] sm:$0xff]  }
 0x1cf   : > { %v690_v51 = vmax.f32 %v672_v46, 0.0  ;;  %2255 = vmatprep.subr.bf16.mxu1 %v2476_v61 }
 0x1d0   : > { %v688_v52 = vmax.f32 %v664_v50, 0.0  ;;  %2256 = vmatpush3.bf16.msra.mxu1 %v2476_v61 }
 0x1d1   : > { %v698_v53 = vpack.c.bf16 %v690_v51, %v689_v45  ;;  %2257 = vmatprep.subr.bf16.mxu1 %v2477_v62 }
 0x1d2   : > { %v697_v54 = vpack.c.bf16 %v688_v52, %v687_v49 }
 0x1d4   : > { %870 = vmatmul.mubr.bf16.gmra.mrb[12].mxu1 %v694_v24 }
 0x1d5   : > { %879 = vmatprep.mubr.bf16.mxu1 %v2846_v48  ;;  %2258 = vmatpush3.bf16.msra.mxu1 %v2477_v62 }
 0x1dc   : > { %880 = vmatmul.mubr.bf16.gmra.mrb[16].mxu1 %v695_v39 }
 0x1dd   : > { %889 = vmatprep.mubr.bf16.mxu1 %v2846_v48 }
 0x1e4   : > { %890 = vmatmul.mubr.bf16.gmra.mrb[20].mxu1 %v696_v38 }
 0x1e5   : > { %899 = vmatprep.mubr.bf16.mxu1 %v2846_v48 }
 0x1ec   : > { %900 = vmatmul.mubr.bf16.gmra.mrb[24].mxu1 %v697_v54 }
 0x1ed   : > { %909 = vmatprep.mubr.bf16.mxu1 %v2846_v48  ;;  %v717_v48 = vlaneseq }
 0x1ef   : > { %v718_v63 = vshrl.u32 %v717_v48, 7 }
 0x1f1   : > { %v719_v0 = vsub.s32 0, %v718_v63  ;;  %v723_v2 = vsub.s32 1, %v718_v63 }
 0x1f3   : > { %v3197_v3 = vrot.slane %v715_v1, %v719_v0  ;;  %v3199_v4 = vrot.slane %v715_v1, %v723_v2 }
 0x1f4   : > { %910 = vmatmul.mubr.bf16.gmra.mrb[28].mxu1 %v698_v53 }
 0x28f   : > { %v841_v5 = vpop.f32.mrb[0].mxu1 }
 0x290   : > { %v842_v6 = vadd.f32 %v841_v5, %v3197_v3  ;;  %v843_v7 = vpop.f32.mrb[1].mxu1 }
 0x291   : > { %v844_v8 = vadd.f32 %v843_v7, %v3199_v4  ;;  %v845_v9 = vpop.f32.mrb[2].mxu1 }
 0x292   : > { %v846_v10 = vadd.f32 %v845_v9, %v3197_v3  ;;  %v847_v11 = vpop.f32.mrb[3].mxu1  ;;  %v920_v13 = vmax.f32 %v842_v6, 0.0 }
 0x293   : > { %v848_v12 = vadd.f32 %v847_v11, %v3199_v4  ;;  %v921_v15 = vmax.f32 %v844_v8, 0.0 }
 0x294   : > { %v922_v14 = vmax.f32 %v846_v10, 0.0 }
 0x295   : > { %v923_v16 = vmax.f32 %v848_v12, 0.0 }
 0x296   : > { %v952_v17 = vpack.c.bf16 %v922_v14, %v920_v13 }
 0x297   : > { %v953_v18 = vpack.c.bf16 %v923_v16, %v921_v15  ;;  %v851_v19 = vpop.f32.mrb[4].mxu1 }
 0x298   : > { %v852_v20 = vadd.f32 %v851_v19, %v3197_v3  ;;  %v853_v21 = vpop.f32.mrb[5].mxu1 }
 0x299   : > { %v854_v22 = vadd.f32 %v853_v21, %v3199_v4  ;;  %v855_v23 = vpop.f32.mrb[6].mxu1  ;;  %1135 = vmatprep.mubr.bf16.mxu0 %v953_v18 }
 0x29a   : > { %v856_v24 = vadd.f32 %v855_v23, %v3197_v3  ;;  %v857_v25 = vpop.f32.mrb[7].mxu1  ;;  %1136 = vmatmul.mubr.bf16.vlgmr.msra.gmra.mrb[16].mxu0 %v952_v17  ;;  %v924_v27 = vmax.f32 %v852_v20, 0.0 }
 0x29b   : > { %v858_v26 = vadd.f32 %v857_v25, %v3199_v4  ;;  %v925_v29 = vmax.f32 %v854_v22, 0.0 }
 0x29c   : > { %v926_v28 = vmax.f32 %v856_v24, 0.0 }
 0x29d   : > { %v927_v30 = vmax.f32 %v858_v26, 0.0 }
 0x29e   : > { %v954_v31 = vpack.c.bf16 %v926_v28, %v924_v27 }
 0x29f   : > { %v955_v32 = vpack.c.bf16 %v927_v30, %v925_v29  ;;  %v861_v33 = vpop.f32.mrb[8].mxu1 }
 0x2a0   : > { %v862_v34 = vadd.f32 %v861_v33, %v3197_v3  ;;  %v863_v35 = vpop.f32.mrb[9].mxu1 }
 0x2a1   : > { %v864_v36 = vadd.f32 %v863_v35, %v3199_v4  ;;  %v865_v37 = vpop.f32.mrb[10].mxu1  ;;  %1143 = vmatprep.mubr.bf16.mxu0 %v955_v32 }
 0x2a2   : > { %v866_v38 = vadd.f32 %v865_v37, %v3197_v3  ;;  %v867_v39 = vpop.f32.mrb[11].mxu1  ;;  %1144 = vmatmul.mubr.bf16.gmra.mrb[20].mxu0 %v954_v31  ;;  %v928_v41 = vmax.f32 %v862_v34, 0.0 }
 0x2a3   : > { %v868_v40 = vadd.f32 %v867_v39, %v3199_v4  ;;  %v929_v43 = vmax.f32 %v864_v36, 0.0 }
 0x2a4   : > { %v930_v42 = vmax.f32 %v866_v38, 0.0 }
 0x2a5   : > { %v931_v44 = vmax.f32 %v868_v40, 0.0 }
 0x2a6   : > { %v956_v45 = vpack.c.bf16 %v930_v42, %v928_v41 }
 0x2a7   : > { %v957_v46 = vpack.c.bf16 %v931_v44, %v929_v43  ;;  %v871_v47 = vpop.f32.mrb[12].mxu1 }
 0x2a8   : > { %v872_v49 = vadd.f32 %v871_v47, %v3197_v3  ;;  %v873_v50 = vpop.f32.mrb[13].mxu1 }
 0x2a9   : > { %v874_v51 = vadd.f32 %v873_v50, %v3199_v4  ;;  %v875_v52 = vpop.f32.mrb[14].mxu1  ;;  %1151 = vmatprep.mubr.bf16.mxu0 %v957_v46 }
 0x2aa   : > { %v876_v53 = vadd.f32 %v875_v52, %v3197_v3  ;;  %v877_v54 = vpop.f32.mrb[15].mxu1  ;;  %1152 = vmatmul.mubr.bf16.gmra.mrb[24].mxu0 %v956_v45  ;;  %v932_v56 = vmax.f32 %v872_v49, 0.0 }
 0x2ab   : > { %v878_v55 = vadd.f32 %v877_v54, %v3199_v4  ;;  %v933_v58 = vmax.f32 %v874_v51, 0.0 }
 0x2ac   : > { %v934_v57 = vmax.f32 %v876_v53, 0.0 }
 0x2ad   : > { %v935_v59 = vmax.f32 %v878_v55, 0.0 }
 0x2ae   : > { %v958_v60 = vpack.c.bf16 %v934_v57, %v932_v56  ;;  %v2478_v57 = vld [vmem:[#allocation9 + $0x20] sm:$0xff]  }
 0x2af   : > { %v959_v61 = vpack.c.bf16 %v935_v59, %v933_v58  ;;  %v881_v62 = vpop.f32.mrb[16].mxu1  ;;  %2259 = vmatprep.subr.bf16.mxu1 %v2478_v57  ;;  %v2479_v58 = vld [vmem:[#allocation9 + $0x28] sm:$0xff]   ;;  %v2480_v59 = vld [vmem:[#allocation9 + $0x30] sm:$0xff]  }
 0x2b0   : > { %v882_v63 = vadd.f32 %v881_v62, %v3197_v3  ;;  %v883_v0 = vpop.f32.mrb[17].mxu1  ;;  %2260 = vmatpush3.bf16.msra.mxu1 %v2478_v57  ;;  %v2485_v62 = vld [vmem:[#allocation10 + $0x18] sm:$0xff]  }
 0x2b1   : > { %v884_v1 = vadd.f32 %v883_v0, %v3199_v4  ;;  %v885_v2 = vpop.f32.mrb[18].mxu1  ;;  %1159 = vmatprep.mubr.bf16.mxu0 %v959_v61  ;;  %2261 = vmatprep.subr.bf16.mxu1 %v2479_v58  ;;  %v2484_v61 = vld [vmem:[#allocation10 + $0x10] sm:$0xff]   ;;  %v3233_v0 = vld [vmem:[#allocation10 + $0x28] sm:$0xff]  }
 0x2b2   : > { %v886_v5 = vadd.f32 %v885_v2, %v3197_v3  ;;  %v887_v6 = vpop.f32.mrb[19].mxu1  ;;  %1160 = vmatmul.mubr.bf16.gmra.mrb[28].mxu0 %v958_v60  ;;  %v936_v8 = vmax.f32 %v882_v63, 0.0  ;;  %v2483_v60 = vld [vmem:[#allocation10 + $0x8] sm:$0xff]   ;;  %v2486_v63 = vld [vmem:[#allocation10 + $0x20] sm:$0xff]  }
 0x2b3   : > { %v888_v7 = vadd.f32 %v887_v6, %v3199_v4  ;;  %v937_v10 = vmax.f32 %v884_v1, 0.0 }
 0x2b4   : > { %v938_v9 = vmax.f32 %v886_v5, 0.0  ;;  %2262 = vmatpush3.bf16.msra.mxu1 %v2479_v58 }
 0x2b5   : > { %v939_v11 = vmax.f32 %v888_v7, 0.0  ;;  %2263 = vmatprep.subr.bf16.mxu1 %v2480_v59  ;;  %v3240_v7 = vld [vmem:[%s3575_s6] ss:$0 sm:$0xff] }
 0x2b6   : > { %v960_v12 = vpack.c.bf16 %v938_v9, %v936_v8 }
 0x2b7   : > { %v961_v13 = vpack.c.bf16 %v939_v11, %v937_v10  ;;  %v891_v14 = vpop.f32.mrb[20].mxu1 }
 0x2b8   : > { %v892_v15 = vadd.f32 %v891_v14, %v3197_v3  ;;  %v893_v16 = vpop.f32.mrb[21].mxu1  ;;  %2264 = vmatpush3.bf16.msra.mxu1 %v2480_v59 }
 0x2b9   : > { %v894_v17 = vadd.f32 %v893_v16, %v3199_v4  ;;  %v895_v18 = vpop.f32.mrb[22].mxu1  ;;  %1167 = vmatprep.mubr.bf16.mxu0 %v961_v13 }
 0x2ba   : > { %v896_v19 = vadd.f32 %v895_v18, %v3197_v3  ;;  %v897_v20 = vpop.f32.mrb[23].mxu1  ;;  %1168 = vmatmul.mubr.bf16.gmra.mrb[32].mxu0 %v960_v12  ;;  %v940_v22 = vmax.f32 %v892_v15, 0.0 }
 0x2bb   : > { %v898_v21 = vadd.f32 %v897_v20, %v3199_v4  ;;  %v941_v24 = vmax.f32 %v894_v17, 0.0 }
 0x2bc   : > { %v942_v23 = vmax.f32 %v896_v19, 0.0 }
 0x2bd   : > { %v943_v25 = vmax.f32 %v898_v21, 0.0 }
 0x2be   : > { %v962_v26 = vpack.c.bf16 %v942_v23, %v940_v22 }
 0x2bf   : > { %v963_v27 = vpack.c.bf16 %v943_v25, %v941_v24  ;;  %v901_v28 = vpop.f32.mrb[24].mxu1 }
 0x2c0   : > { %v902_v29 = vadd.f32 %v901_v28, %v3197_v3  ;;  %v903_v30 = vpop.f32.mrb[25].mxu1 }
 0x2c1   : > { %v904_v31 = vadd.f32 %v903_v30, %v3199_v4  ;;  %v905_v32 = vpop.f32.mrb[26].mxu1  ;;  %1175 = vmatprep.mubr.bf16.mxu0 %v963_v27 }
 0x2c2   : > { %v906_v33 = vadd.f32 %v905_v32, %v3197_v3  ;;  %v907_v34 = vpop.f32.mrb[27].mxu1  ;;  %1176 = vmatmul.mubr.bf16.gmra.mrb[36].mxu0 %v962_v26  ;;  %v944_v36 = vmax.f32 %v902_v29, 0.0 }
 0x2c3   : > { %v908_v35 = vadd.f32 %v907_v34, %v3199_v4  ;;  %v945_v38 = vmax.f32 %v904_v31, 0.0 }
 0x2c4   : > { %v946_v37 = vmax.f32 %v906_v33, 0.0 }
 0x2c5   : > { %v947_v39 = vmax.f32 %v908_v35, 0.0 }
 0x2c6   : > { %v964_v40 = vpack.c.bf16 %v946_v37, %v944_v36 }
 0x2c7   : > { %v965_v41 = vpack.c.bf16 %v947_v39, %v945_v38  ;;  %v911_v42 = vpop.f32.mrb[28].mxu1 }
 0x2c8   : > { %v912_v43 = vadd.f32 %v911_v42, %v3197_v3  ;;  %v913_v44 = vpop.f32.mrb[29].mxu1 }
 0x2c9   : > { %v914_v45 = vadd.f32 %v913_v44, %v3199_v4  ;;  %v915_v46 = vpop.f32.mrb[30].mxu1  ;;  %1183 = vmatprep.mubr.bf16.mxu0 %v965_v41 }
 0x2ca   : > { %v916_v47 = vadd.f32 %v915_v46, %v3197_v3  ;;  %v917_v49 = vpop.f32.mrb[31].mxu1  ;;  %1184 = vmatmul.mubr.bf16.gmra.mrb[40].mxu0 %v964_v40  ;;  %v948_v51 = vmax.f32 %v912_v43, 0.0  ;;  %v2481_v3 = vld [vmem:[#allocation9 + $0x38] sm:$0xff]  }
 0x2cb   : > { %v918_v50 = vadd.f32 %v917_v49, %v3199_v4  ;;  %v949_v53 = vmax.f32 %v914_v45, 0.0  ;;  %2265 = vmatprep.subr.bf16.mxu1 %v2481_v3  ;;  %v2482_v4 = vld [vmem:[#allocation10] sm:$0xff]  }
 0x2cc   : > { %v950_v52 = vmax.f32 %v916_v47, 0.0  ;;  %2266 = vmatpush3.bf16.msra.mxu1 %v2481_v3  ;;  %2283 = vmatprep.subr.bf16.mxu0 %v2482_v4 }
 0x2cd   : > { %v951_v54 = vmax.f32 %v918_v50, 0.0  ;;  %2315 = vmatprep.subr.bf16.mxu1 %v2482_v4  ;;  %2284 = vmatpush3.bf16.msra.mxu0 %v2482_v4 }
 0x2ce   : > { %v966_v55 = vpack.c.bf16 %v950_v52, %v948_v51  ;;  %2285 = vmatprep.subr.bf16.mxu0 %v2483_v60 }
 0x2cf   : > { %v967_v56 = vpack.c.bf16 %v951_v54, %v949_v53 }
 0x2d1   : > { %1191 = vmatprep.mubr.bf16.mxu0 %v967_v56  ;;  %2286 = vmatpush3.bf16.msra.mxu0 %v2483_v60 }
 0x2d2   : > { %1192 = vmatmul.mubr.bf16.gmra.mrb[44].mxu0 %v966_v55  ;;  %2287 = vmatprep.subr.bf16.mxu0 %v2484_v61 }
 0x2d5   : > { %2288 = vmatpush3.bf16.msra.mxu0 %v2484_v61 }
 0x2d6   : > { %2289 = vmatprep.subr.bf16.mxu0 %v2485_v62 }
 0x2d9   : > { %2290 = vmatpush3.bf16.msra.mxu0 %v2485_v62 }
 0x2da   : > { %2291 = vmatprep.subr.bf16.mxu0 %v2486_v63 }
 0x2dd   : > { %2292 = vmatpush3.bf16.msra.mxu0 %v2486_v63 }
 0x2de   : > { %2293 = vmatprep.subr.bf16.mxu0 %v3233_v0 }
 0x2e1   : > { %2294 = vmatpush3.bf16.msra.mxu0 %v3233_v0 }
 0x36d   : > { %v2139_v1 = vpop.f32.mrb[16].mxu0 }
 0x36e   : > { %v2140_v2 = vpop.f32.mrb[17].mxu0 }
 0x36f   : > { %v2141_v5 = vadd.f32 %v2140_v2, %v2139_v1  ;;  %v2142_v6 = vpop.f32.mrb[18].mxu0 }
 0x370   : > { %v2143_v8 = vpop.f32.mrb[19].mxu0 }
 0x371   : > { %v2144_v9 = vadd.f32 %v2143_v8, %v2142_v6  ;;  %v1138_v10 = vadd.f32 %v2141_v5, %v3240_v7 }
 0x373   : > { %v1141_v11 = vadd.f32 %v2144_v9, %v3240_v7 }
 0x375   : > { %v2145_v12 = vpop.f32.mrb[20].mxu0  ;;  %v1200_v13 = vpack.c.bf16 %v1141_v11, %v1138_v10 }
 0x376   : > { %v2146_v14 = vpop.f32.mrb[21].mxu0 }
 0x377   : > { %v2147_v15 = vadd.f32 %v2146_v14, %v2145_v12  ;;  %v2148_v16 = vpop.f32.mrb[22].mxu0  ;;  %2267 = vmatprep.mubr.bf16.mxu1 %v1200_v13  ;;  %v2488_v14 = vld [vmem:[#allocation10 + $0x30] sm:$0xff]  }
 0x378   : > { %v2149_v17 = vpop.f32.mrb[23].mxu0  ;;  %2295 = vmatprep.subr.bf16.mxu0 %v2488_v14 }
 0x379   : > { %v2150_v18 = vadd.f32 %v2149_v17, %v2148_v16  ;;  %v1146_v19 = vadd.f32 %v2147_v15, %v3240_v7  ;;  %2296 = vmatpush3.bf16.msra.mxu0 %v2488_v14  ;;  %v2489_v15 = vld [vmem:[#allocation10 + $0x38] sm:$0xff]   ;;  %v2070_v16 = vld [vmem:[%s3607_s30] ss:$0 sm:$0xff] }
 0x37a   : > { %2297 = vmatprep.subr.bf16.mxu0 %v2489_v15 }
 0x37b   : > { %v1149_v20 = vadd.f32 %v2150_v18, %v3240_v7 }
 0x37d   : > { %v1201_v21 = vpack.c.bf16 %v1149_v20, %v1146_v19  ;;  %v2151_v22 = vpop.f32.mrb[24].mxu0  ;;  %2298 = vmatpush3.bf16.msra.mxu0 %v2489_v15 }
 0x37e   : > { %v2152_v23 = vpop.f32.mrb[25].mxu0 }
 0x37f   : > { %v2153_v24 = vadd.f32 %v2152_v23, %v2151_v22  ;;  %v2154_v25 = vpop.f32.mrb[26].mxu0  ;;  %2268 = vmatmul.mubr.bf16.vlgmr.msra.gmra.mrb[32].mxu1 %v1201_v21 }
 0x380   : > { %v2155_v26 = vpop.f32.mrb[27].mxu0  ;;  %2323 = vmatpush3.bf16.msra.mxu1 %v2482_v4 }
 0x381   : > { %v2156_v27 = vadd.f32 %v2155_v26, %v2154_v25  ;;  %2316 = vmatprep.subr.bf16.mxu1 %v2483_v60  ;;  %v1154_v28 = vadd.f32 %v2153_v24, %v3240_v7 }
 0x383   : > { %v1157_v29 = vadd.f32 %v2156_v27, %v3240_v7 }
 0x384   : > { %2324 = vmatpush3.bf16.msra.mxu1 %v2483_v60 }
 0x385   : > { %v2157_v30 = vpop.f32.mrb[28].mxu0  ;;  %v1202_v31 = vpack.c.bf16 %v1157_v29, %v1154_v28  ;;  %2317 = vmatprep.subr.bf16.mxu1 %v2484_v61 }
 0x386   : > { %v2158_v32 = vpop.f32.mrb[29].mxu0 }
 0x387   : > { %v2159_v33 = vadd.f32 %v2158_v32, %v2157_v30  ;;  %v2160_v34 = vpop.f32.mrb[30].mxu0  ;;  %2271 = vmatprep.mubr.bf16.mxu1 %v1202_v31 }
 0x388   : > { %v2161_v35 = vpop.f32.mrb[31].mxu0  ;;  %2325 = vmatpush3.bf16.msra.mxu1 %v2484_v61 }
 0x389   : > { %v2162_v36 = vadd.f32 %v2161_v35, %v2160_v34  ;;  %2318 = vmatprep.subr.bf16.mxu1 %v2485_v62  ;;  %v1162_v37 = vadd.f32 %v2159_v33, %v3240_v7 }
 0x38b   : > { %v1165_v38 = vadd.f32 %v2162_v36, %v3240_v7 }
 0x38c   : > { %2326 = vmatpush3.bf16.msra.mxu1 %v2485_v62 }
 0x38d   : > { %v2163_v39 = vpop.f32.mrb[32].mxu0  ;;  %v1203_v40 = vpack.c.bf16 %v1165_v38, %v1162_v37  ;;  %2319 = vmatprep.subr.bf16.mxu1 %v2486_v63 }
 0x38e   : > { %v2164_v41 = vpop.f32.mrb[33].mxu0 }
 0x38f   : > { %v2165_v42 = vadd.f32 %v2164_v41, %v2163_v39  ;;  %v2166_v43 = vpop.f32.mrb[34].mxu0  ;;  %2272 = vmatmul.mubr.bf16.gmra.mrb[36].mxu1 %v1203_v40 }
 0x390   : > { %v2167_v44 = vpop.f32.mrb[35].mxu0  ;;  %2327 = vmatpush3.bf16.msra.mxu1 %v2486_v63 }
 0x391   : > { %v2168_v45 = vadd.f32 %v2167_v44, %v2166_v43  ;;  %2320 = vmatprep.subr.bf16.mxu1 %v3233_v0  ;;  %v1170_v46 = vadd.f32 %v2165_v42, %v3240_v7 }
 0x393   : > { %v1173_v47 = vadd.f32 %v2168_v45, %v3240_v7 }
 0x394   : > { %2328 = vmatpush3.bf16.msra.mxu1 %v3233_v0 }
 0x395   : > { %v2169_v49 = vpop.f32.mrb[36].mxu0  ;;  %v1204_v50 = vpack.c.bf16 %v1173_v47, %v1170_v46  ;;  %2321 = vmatprep.subr.bf16.mxu1 %v2488_v14 }
 0x396   : > { %v2170_v51 = vpop.f32.mrb[37].mxu0 }
 0x397   : > { %v2171_v52 = vadd.f32 %v2170_v51, %v2169_v49  ;;  %v2172_v53 = vpop.f32.mrb[38].mxu0  ;;  %2275 = vmatprep.mubr.bf16.mxu1 %v1204_v50 }
 0x398   : > { %v2173_v54 = vpop.f32.mrb[39].mxu0  ;;  %2329 = vmatpush3.bf16.msra.mxu1 %v2488_v14 }
 0x399   : > { %v2174_v55 = vadd.f32 %v2173_v54, %v2172_v53  ;;  %v1178_v56 = vadd.f32 %v2171_v52, %v3240_v7  ;;  %2322 = vmatprep.subr.bf16.mxu1 %v2489_v15 }
 0x39b   : > { %v1181_v57 = vadd.f32 %v2174_v55, %v3240_v7 }
 0x39c   : > { %2330 = vmatpush3.bf16.msra.mxu1 %v2489_v15 }
 0x39d   : > { %v2175_v58 = vpop.f32.mrb[40].mxu0  ;;  %v1205_v59 = vpack.c.bf16 %v1181_v57, %v1178_v56 }
 0x39e   : > { %v2176_v3 = vpop.f32.mrb[41].mxu0 }
 0x39f   : > { %v2177_v4 = vadd.f32 %v2176_v3, %v2175_v58  ;;  %v2178_v60 = vpop.f32.mrb[42].mxu0  ;;  %2276 = vmatmul.mubr.bf16.gmra.mrb[40].mxu1 %v1205_v59 }
 0x3a0   : > { %v2179_v61 = vpop.f32.mrb[43].mxu0 }
 0x3a1   : > { %v2180_v62 = vadd.f32 %v2179_v61, %v2178_v60  ;;  %v1186_v63 = vadd.f32 %v2177_v4, %v3240_v7 }
 0x3a3   : > { %v1189_v0 = vadd.f32 %v2180_v62, %v3240_v7 }
 0x3a5   : > { %v2181_v1 = vpop.f32.mrb[44].mxu0  ;;  %v1206_v2 = vpack.c.bf16 %v1189_v0, %v1186_v63 }
 0x3a6   : > { %v2182_v5 = vpop.f32.mrb[45].mxu0 }
 0x3a7   : > { %v2183_v6 = vadd.f32 %v2182_v5, %v2181_v1  ;;  %v2184_v8 = vpop.f32.mrb[46].mxu0  ;;  %2279 = vmatprep.mubr.bf16.mxu1 %v1206_v2 }
 0x3a8   : > { %v2185_v9 = vpop.f32.mrb[47].mxu0 }
 0x3a9   : > { %v2186_v10 = vadd.f32 %v2185_v9, %v2184_v8  ;;  %v1194_v11 = vadd.f32 %v2183_v6, %v3240_v7 }
 0x3ab   : > { %v1197_v12 = vadd.f32 %v2186_v10, %v3240_v7  ;;  %v3266_v10 = vld [vmem:[%s3608_s23] ss:$0 sm:$0xff] }
 0x3ad   : > { %v1207_v13 = vpack.c.bf16 %v1197_v12, %v1194_v11 }
 0x3af   : > { %2280 = vmatmul.mubr.bf16.gmra.mrb[44].mxu1 %v1207_v13 }
 0x452   : > { %v2269_v17 = vpop.f32.mrb[32].mxu1 }
 0x453   : > { %v1322_v18 = vadd.f32 %v2269_v17, %v2070_v16  ;;  %v1313_v19 = vpop.f32.mrb[33].mxu1 }
 0x454   : > { %v1314_v7 = vadd.f32 %v2070_v16, %v1313_v19  ;;  %v2270_v20 = vpop.f32.mrb[34].mxu1 }
 0x455   : > { %v1325_v21 = vadd.f32 %v2270_v20, %v2070_v16  ;;  %v1316_v22 = vpop.f32.mrb[35].mxu1  ;;  %v1378_v24 = vmax.f32 %v1322_v18, 0.0 }
 0x456   : > { %v1317_v23 = vadd.f32 %v2070_v16, %v1316_v22  ;;  %v1376_v26 = vmax.f32 %v1314_v7, 0.0 }
 0x457   : > { %v1379_v25 = vmax.f32 %v1325_v21, 0.0 }
 0x458   : > { %v1377_v27 = vmax.f32 %v1317_v23, 0.0 }
 0x459   : > { %v1393_v28 = vpack.c.bf16 %v1379_v25, %v1378_v24 }
 0x45a   : > { %v1392_v29 = vpack.c.bf16 %v1377_v27, %v1376_v26 }
 0x45c   : > { %2299 = vmatprep.mubr.bf16.mxu0 %v1392_v29 }
 0x45d   : > { %2300 = vmatmul.mubr.bf16.vlgmr.msra.gmra.mrb[48].mxu0 %v1393_v28 }
 0x462   : > { %v2273_v30 = vpop.f32.mrb[36].mxu1 }
 0x463   : > { %v1338_v31 = vadd.f32 %v2273_v30, %v2070_v16  ;;  %v1329_v32 = vpop.f32.mrb[37].mxu1 }
 0x464   : > { %v1330_v33 = vadd.f32 %v2070_v16, %v1329_v32  ;;  %v2274_v34 = vpop.f32.mrb[38].mxu1 }
 0x465   : > { %v1341_v35 = vadd.f32 %v2274_v34, %v2070_v16  ;;  %v1332_v36 = vpop.f32.mrb[39].mxu1  ;;  %v1382_v38 = vmax.f32 %v1338_v31, 0.0 }
 0x466   : > { %v1333_v37 = vadd.f32 %v2070_v16, %v1332_v36  ;;  %v1380_v40 = vmax.f32 %v1330_v33, 0.0 }
 0x467   : > { %v1383_v39 = vmax.f32 %v1341_v35, 0.0 }
 0x468   : > { %v1381_v41 = vmax.f32 %v1333_v37, 0.0 }
 0x469   : > { %v1395_v42 = vpack.c.bf16 %v1383_v39, %v1382_v38 }
 0x46a   : > { %v1394_v43 = vpack.c.bf16 %v1381_v41, %v1380_v40 }
 0x46c   : > { %2303 = vmatprep.mubr.bf16.mxu0 %v1394_v43 }
 0x46d   : > { %2304 = vmatmul.mubr.bf16.gmra.mrb[52].mxu0 %v1395_v42 }
 0x472   : > { %v2277_v44 = vpop.f32.mrb[40].mxu1 }
 0x473   : > { %v1354_v45 = vadd.f32 %v2277_v44, %v2070_v16  ;;  %v1345_v46 = vpop.f32.mrb[41].mxu1 }
 0x474   : > { %v1346_v47 = vadd.f32 %v2070_v16, %v1345_v46  ;;  %v2278_v49 = vpop.f32.mrb[42].mxu1 }
 0x475   : > { %v1357_v50 = vadd.f32 %v2278_v49, %v2070_v16  ;;  %v1348_v51 = vpop.f32.mrb[43].mxu1  ;;  %v1386_v53 = vmax.f32 %v1354_v45, 0.0 }
 0x476   : > { %v1349_v52 = vadd.f32 %v2070_v16, %v1348_v51  ;;  %v1384_v55 = vmax.f32 %v1346_v47, 0.0  ;;  %v3297_v51 = vand.u32 127, %v717_v48 }
 0x477   : > { %v1387_v54 = vmax.f32 %v1357_v50, 0.0 }
 0x478   : > { %v1385_v56 = vmax.f32 %v1349_v52, 0.0  ;;  %vm1698_vm0 = vcmp.lt.s32.totalorder %v3297_v51, 10 }
 0x479   : > { %v1397_v57 = vpack.c.bf16 %v1387_v54, %v1386_v53 }
 0x47a   : > { %v1396_v58 = vpack.c.bf16 %v1385_v56, %v1384_v55 }
 0x47c   : > { %2307 = vmatprep.mubr.bf16.mxu1 %v1396_v58 }
 0x47d   : > { %2308 = vmatmul.mubr.bf16.vlgmr.msra.gmra.mrb[48].mxu1 %v1397_v57 }
 0x482   : > { %v2281_v59 = vpop.f32.mrb[44].mxu1 }
 0x483   : > { %v1370_v3 = vadd.f32 %v2281_v59, %v2070_v16  ;;  %v1361_v4 = vpop.f32.mrb[45].mxu1 }
 0x484   : > { %v1362_v60 = vadd.f32 %v2070_v16, %v1361_v4  ;;  %v2282_v61 = vpop.f32.mrb[46].mxu1 }
 0x485   : > { %v1373_v62 = vadd.f32 %v2282_v61, %v2070_v16  ;;  %v1364_v63 = vpop.f32.mrb[47].mxu1  ;;  %v1390_v1 = vmax.f32 %v1370_v3, 0.0 }
 0x486   : > { %v1365_v0 = vadd.f32 %v2070_v16, %v1364_v63  ;;  %v1388_v5 = vmax.f32 %v1362_v60, 0.0 }
 0x487   : > { %v1391_v2 = vmax.f32 %v1373_v62, 0.0 }
 0x488   : > { %v1389_v6 = vmax.f32 %v1365_v0, 0.0 }
 0x489   : > { %v1399_v8 = vpack.c.bf16 %v1391_v2, %v1390_v1 }
 0x48a   : > { %v1398_v9 = vpack.c.bf16 %v1389_v6, %v1388_v5 }
 0x48c   : > { %2311 = vmatprep.mubr.bf16.mxu1 %v1398_v9 }
 0x48d   : > { %2312 = vmatmul.mubr.bf16.gmra.mrb[52].mxu1 %v1399_v8 }
 0x530   : > { %v2301_v11 = vpop.f32.mrb[48].mxu0 }
 0x531   : > { %v1514_v12 = vadd.f32 %v2301_v11, %v3266_v10  ;;  %v1505_v13 = vpop.f32.mrb[49].mxu0 }
 0x532   : > { %v1506_v14 = vadd.f32 %v3266_v10, %v1505_v13  ;;  %v2302_v15 = vpop.f32.mrb[50].mxu0 }
 0x533   : > { %v1570_v16 = vmax.f32 %v1514_v12, 0.0  ;;  %v1517_v17 = vadd.f32 %v2302_v15, %v3266_v10  ;;  %v1508_v18 = vpop.f32.mrb[51].mxu0 }
 0x534   : > { %v1568_v19 = vmax.f32 %v1506_v14, 0.0  ;;  %v1509_v7 = vadd.f32 %v3266_v10, %v1508_v18 }
 0x535   : > { %v2090_v20 = vmul.f32 -1.442695, %v1570_v16  ;;  %v1571_v21 = vmax.f32 %v1517_v17, 0.0 }
 0x536   : > { %v2088_v22 = vmul.f32 -1.442695, %v1568_v19  ;;  %v1569_v23 = vmax.f32 %v1509_v7, 0.0 }
 0x537   : > { %2490 = vpow2.f32 %v2090_v20  ;;  %v2091_v24 = vmul.f32 -1.442695, %v1571_v21 }
 0x538   : > { %2492 = vpow2.f32 %v2088_v22  ;;  %v2089_v25 = vmul.f32 -1.442695, %v1569_v23 }
 0x539   : > { %2494 = vpow2.f32 %v2091_v24 }
 0x53a   : > { %2496 = vpow2.f32 %v2089_v25 }
 0x540   : > { %v2305_v26 = vpop.f32.mrb[52].mxu0 }
 0x541   : > { %v2491_v27 = vpop.eup %2490  ;;  %v3273_v28 = vadd.f32 %v2305_v26, %v3266_v10  ;;  %v1521_v29 = vpop.f32.mrb[53].mxu0 }
 0x542   : > { %v2493_v30 = vpop.eup %2492  ;;  %v1634_v31 = vadd.f32 1.0, %v2491_v27  ;;  %v3276_v32 = vadd.f32 %v3266_v10, %v1521_v29  ;;  %v2306_v33 = vpop.f32.mrb[54].mxu0 }
 0x543   : > { %v2495_v34 = vpop.eup %2494  ;;  %v1632_v35 = vadd.f32 1.0, %v2493_v30  ;;  %v1574_v36 = vmax.f32 %v3273_v28, 0.0  ;;  %v3280_v37 = vadd.f32 %v2306_v33, %v3266_v10  ;;  %v1524_v38 = vpop.f32.mrb[55].mxu0 }
 0x544   : > { %v2497_v39 = vpop.eup %2496  ;;  %2498 = vrcp.f32 %v1634_v31  ;;  %v1635_v40 = vadd.f32 1.0, %v2495_v34  ;;  %v1572_v41 = vmax.f32 %v3276_v32, 0.0  ;;  %v3284_v42 = vadd.f32 %v3266_v10, %v1524_v38 }
 0x545   : > { %2500 = vrcp.f32 %v1632_v35  ;;  %v1633_v43 = vadd.f32 1.0, %v2497_v39  ;;  %v2094_v44 = vmul.f32 -1.442695, %v1574_v36  ;;  %v1575_v45 = vmax.f32 %v3280_v37, 0.0 }
 0x546   : > { %2502 = vrcp.f32 %v1635_v40  ;;  %v2092_v46 = vmul.f32 -1.442695, %v1572_v41  ;;  %v1573_v47 = vmax.f32 %v3284_v42, 0.0 }
 0x547   : > { %2504 = vrcp.f32 %v1633_v43  ;;  %v2095_v49 = vmul.f32 -1.442695, %v1575_v45 }
 0x548   : > { %2506 = vpow2.f32 %v2094_v44  ;;  %v2093_v50 = vmul.f32 -1.442695, %v1573_v47 }
 0x549   : > { %2508 = vpow2.f32 %v2092_v46 }
 0x54a   : > { %2510 = vpow2.f32 %v2095_v49 }
 0x54b   : > { %2512 = vpow2.f32 %v2093_v50 }
 0x54e   : > { %v2499_v52 = vpop.eup %2498 }
 0x54f   : > { %v2501_v53 = vpop.eup %2500  ;;  %v1682_v54 = vmul.f32 %v2499_v52, %v1570_v16 }
 0x550   : > { %v2503_v55 = vpop.eup %2502  ;;  %v2309_v56 = vpop.f32.mrb[48].mxu1  ;;  %v1680_v57 = vmul.f32 %v2501_v53, %v1568_v19 }
 0x551   : > { %v2505_v58 = vpop.eup %2504  ;;  %v3301_v59 = vadd.f32 %v2309_v56, %v3266_v10  ;;  %v1537_v3 = vpop.f32.mrb[49].mxu1  ;;  %v3305_v4 = vsel %vm1698_vm0, %v1682_v54, -1e+30  ;;  %v1683_v48 = vmul.f32 %v2503_v55, %v1571_v21 }
 0x552   : > { %v2507_v60 = vpop.eup %2506  ;;  %v3308_v61 = vadd.f32 %v3266_v10, %v1537_v3  ;;  %v2310_v62 = vpop.f32.mrb[50].mxu1  ;;  %1719 = vmax.xlane.f32.xlu1 %v3305_v4  ;;  %v3313_v63 = vsel %vm1698_vm0, %v1680_v57, -1e+30  ;;  %v1681_v0 = vmul.f32 %v2505_v58, %v1569_v23 }
 0x553   : > { %v2509_v1 = vpop.eup %2508  ;;  %v1638_v2 = vadd.f32 1.0, %v2507_v60  ;;  %v1578_v5 = vmax.f32 %v3301_v59, 0.0  ;;  %v3317_v6 = vadd.f32 %v2310_v62, %v3266_v10  ;;  %v1540_v8 = vpop.f32.mrb[51].mxu1  ;;  %1715 = vmax.xlane.f32.xlu0 %v3313_v63  ;;  %v3322_v9 = vsel %vm1698_vm0, %v1683_v48, -1e+30 }
 0x554   : > { %v2511_v11 = vpop.eup %2510  ;;  %v1636_v12 = vadd.f32 1.0, %v2509_v1  ;;  %v1576_v13 = vmax.f32 %v3308_v61, 0.0  ;;  %v3326_v14 = vadd.f32 %v3266_v10, %v1540_v8  ;;  %v3330_v15 = vsel %vm1698_vm0, %v1681_v0, -1e+30 }
 0x555   : > { %v2513_v16 = vpop.eup %2512  ;;  %2514 = vrcp.f32 %v1638_v2  ;;  %v1639_v17 = vadd.f32 1.0, %v2511_v11  ;;  %v2098_v18 = vmul.f32 -1.442695, %v1578_v5  ;;  %v1579_v19 = vmax.f32 %v3317_v6, 0.0 }
 0x556   : > { %2516 = vrcp.f32 %v1636_v12  ;;  %v1637_v7 = vadd.f32 1.0, %v2513_v16  ;;  %v2096_v20 = vmul.f32 -1.442695, %v1576_v13  ;;  %v1577_v21 = vmax.f32 %v3326_v14, 0.0  ;;  %1721 = vmax.xlane.f32.xlu1 %v3322_v9 }
 0x557   : > { %2518 = vrcp.f32 %v1639_v17  ;;  %v2099_v22 = vmul.f32 -1.442695, %v1579_v19  ;;  %1717 = vmax.xlane.f32.xlu0 %v3330_v15 }
 0x558   : > { %2520 = vrcp.f32 %v1637_v7  ;;  %v2097_v23 = vmul.f32 -1.442695, %v1577_v21 }
 0x559   : > { %2522 = vpow2.f32 %v2098_v18 }
 0x55a   : > { %2524 = vpow2.f32 %v2096_v20 }
 0x55b   : > { %2526 = vpow2.f32 %v2099_v22 }
 0x55c   : > { %2528 = vpow2.f32 %v2097_v23 }
 0x55f   : > { %v2515_v24 = vpop.eup %2514 }
 0x560   : > { %v2517_v25 = vpop.eup %2516  ;;  %v2313_v26 = vpop.f32.mrb[52].mxu1  ;;  %v1686_v27 = vmul.f32 %v2515_v24, %v1574_v36 }
 0x561   : > { %v2519_v29 = vpop.eup %2518  ;;  %v3347_v30 = vadd.f32 %v2313_v26, %v3266_v10  ;;  %v1553_v31 = vpop.f32.mrb[53].mxu1  ;;  %v1684_v33 = vmul.f32 %v2517_v25, %v1572_v41 }
 0x562   : > { %v2521_v34 = vpop.eup %2520  ;;  %v3352_v35 = vadd.f32 %v3266_v10, %v1553_v31  ;;  %v2314_v38 = vpop.f32.mrb[54].mxu1  ;;  %v3356_v39 = vsel %vm1698_vm0, %v1686_v27, -1e+30  ;;  %v1687_v28 = vmul.f32 %v2519_v29, %v1575_v45 }
 0x563   : > { %v2523_v36 = vpop.eup %2522  ;;  %v1582_v40 = vmax.f32 %v3347_v30, 0.0  ;;  %v3362_v43 = vadd.f32 %v2314_v38, %v3266_v10  ;;  %1727 = vmax.xlane.f32.xlu0 %v3356_v39  ;;  %v1556_v32 = vpop.f32.mrb[55].mxu1  ;;  %v1685_v41 = vmul.f32 %v2521_v34, %v1573_v47  ;;  %v3377_v42 = vsel %vm1698_vm0, %v1684_v33, -1e+30 }
 0x564   : > { %v2525_v44 = vpop.eup %2524  ;;  %v1642_v46 = vadd.f32 1.0, %v2523_v36  ;;  %v1580_v49 = vmax.f32 %v3352_v35, 0.0  ;;  %v1557_v50 = vadd.f32 %v3266_v10, %v1556_v32  ;;  %v3371_v37 = vsel %vm1698_vm0, %v1687_v28, -1e+30 }
 0x565   : > { %v2527_v45 = vpop.eup %2526  ;;  %v1640_v52 = vadd.f32 1.0, %v2525_v44  ;;  %v1583_v53 = vmax.f32 %v3362_v43, 0.0  ;;  %1729 = vmax.xlane.f32.xlu1 %v3371_v37  ;;  %v2102_v10 = vmul.f32 -1.442695, %v1582_v40  ;;  %v3384_v3 = vsel %vm1698_vm0, %v1685_v41, -1e+30 }
 0x566   : > { %v2529_v47 = vpop.eup %2528  ;;  %2530 = vrcp.f32 %v1642_v46  ;;  %v1643_v54 = vadd.f32 1.0, %v2527_v45  ;;  %v1581_v55 = vmax.f32 %v1557_v50, 0.0  ;;  %v2100_v57 = vmul.f32 -1.442695, %v1580_v49 }
 0x567   : > { %2532 = vrcp.f32 %v1640_v52  ;;  %v1641_v56 = vadd.f32 1.0, %v2529_v47  ;;  %1723 = vmax.xlane.f32.xlu0 %v3377_v42  ;;  %v2103_v58 = vmul.f32 -1.442695, %v1583_v53 }
 0x568   : > { %2534 = vrcp.f32 %v1643_v54  ;;  %v2101_v48 = vmul.f32 -1.442695, %v1581_v55 }
 0x569   : > { %2536 = vrcp.f32 %v1641_v56  ;;  %1725 = vmax.xlane.f32.xlu1 %v3384_v3 }
 0x56a   : > { %2538 = vpow2.f32 %v2102_v10 }
 0x56b   : > { %2540 = vpow2.f32 %v2100_v57 }
 0x56c   : > { %2542 = vpow2.f32 %v2103_v58 }
 0x56d   : > { %2544 = vpow2.f32 %v2101_v48 }
 0x570   : > { %v2531_v60 = vpop.eup %2530 }
 0x571   : > { %v2533_v62 = vpop.eup %2532  ;;  %v1690_v0 = vmul.f32 %v2531_v60, %v1578_v5 }
 0x572   : > { %v2535_v1 = vpop.eup %2534  ;;  %v1688_v12 = vmul.f32 %v2533_v62, %v1576_v13 }
 0x573   : > { %v2537_v2 = vpop.eup %2536  ;;  %v3391_v8 = vsel %vm1698_vm0, %v1690_v0, -1e+30  ;;  %v1691_v11 = vmul.f32 %v2535_v1, %v1579_v19 }
 0x574   : > { %v2539_v16 = vpop.eup %2538  ;;  %1735 = vmax.xlane.f32.xlu0 %v3391_v8  ;;  %v1689_v5 = vmul.f32 %v2537_v2, %v1577_v21  ;;  %v3407_v13 = vsel %vm1698_vm0, %v1688_v12, -1e+30 }
 0x575   : > { %v2541_v17 = vpop.eup %2540  ;;  %v1646_v18 = vadd.f32 1.0, %v2539_v16  ;;  %v3400_v59 = vsel %vm1698_vm0, %v1691_v11, -1e+30 }
 0x576   : > { %v2543_v7 = vpop.eup %2542  ;;  %v1644_v20 = vadd.f32 1.0, %v2541_v17  ;;  %1737 = vmax.xlane.f32.xlu1 %v3400_v59  ;;  %v3412_v14 = vsel %vm1698_vm0, %v1689_v5, -1e+30 }
 0x577   : > { %v2545_v6 = vpop.eup %2544  ;;  %2546 = vrcp.f32 %v1646_v18  ;;  %v1647_v61 = vadd.f32 1.0, %v2543_v7 }
 0x578   : > { %2548 = vrcp.f32 %v1644_v20  ;;  %v1645_v19 = vadd.f32 1.0, %v2545_v6  ;;  %1731 = vmax.xlane.f32.xlu0 %v3407_v13 }
 0x579   : > { %2550 = vrcp.f32 %v1647_v61 }
 0x57a   : > { %2552 = vrcp.f32 %v1645_v19  ;;  %1733 = vmax.xlane.f32.xlu1 %v3412_v14 }
 0x581   : > { %v2547_v21 = vpop.eup %2546 }
 0x582   : > { %v2549_v22 = vpop.eup %2548  ;;  %v1694_v29 = vmul.f32 %v2547_v21, %v1582_v40 }
 0x583   : > { %v2551_v23 = vpop.eup %2550  ;;  %v1692_v24 = vmul.f32 %v2549_v22, %v1580_v49 }
 0x584   : > { %v2553_v25 = vpop.eup %2552  ;;  %v1695_v33 = vmul.f32 %v2551_v23, %v1583_v53  ;;  %v3429_v34 = vsel %vm1698_vm0, %v1694_v29, -1e+30 }
 0x585   : > { %v3417_v26 = vsel %vm1698_vm0, %v1692_v24, -1e+30  ;;  %v1693_v27 = vmul.f32 %v2553_v25, %v1581_v55 }
 0x586   : > { %1739 = vmax.xlane.f32.xlu0 %v3417_v26  ;;  %v3434_v35 = vsel %vm1698_vm0, %v1695_v33, -1e+30 }
 0x587   : > { %v3424_v31 = vsel %vm1698_vm0, %v1693_v27, -1e+30 }
 0x588   : > { %1741 = vmax.xlane.f32.xlu1 %v3424_v31 }
 0x58a   : > { %1743 = vmax.xlane.f32.xlu0 %v3429_v34 }
 0x58c   : > { %1745 = vmax.xlane.f32.xlu1 %v3434_v35 }
 0x5df   : > { %v1720_v30 = vpop.xlane.xlu1 %1719 }
 0x5e0   : > { %v3438_v38 = vsub.f32 %v3305_v4, %v1720_v30  ;;  %v1716_v28 = vpop.xlane.xlu0 %1715 }
 0x5e1   : > { %v3441_v36 = vsub.f32 %v3313_v63, %v1716_v28 }
 0x5e2   : > { %v1767_v40 = vmul.f32 1.442695, %v3438_v38 }
 0x5e3   : > { %v1763_v43 = vmul.f32 1.442695, %v3441_v36  ;;  %v1722_v32 = vpop.xlane.xlu1 %1721 }
 0x5e4   : > { %2554 = vpow2.f32 %v1767_v40  ;;  %v3446_v51 = vsub.f32 %v3322_v9, %v1722_v32  ;;  %v1718_v41 = vpop.xlane.xlu0 %1717 }
 0x5e5   : > { %v3449_v44 = vsub.f32 %v3330_v15, %v1718_v41  ;;  %2556 = vpow2.f32 %v1763_v43 }
 0x5e6   : > { %v1769_v4 = vmul.f32 1.442695, %v3446_v51 }
 0x5e7   : > { %v1765_v63 = vmul.f32 1.442695, %v3449_v44 }
 0x5e8   : > { %2558 = vpow2.f32 %v1769_v4 }
 0x5e9   : > { %2560 = vpow2.f32 %v1765_v63 }
 0x5ee   : > { %v2555_v46 = vpop.eup %2554 }
 0x5ef   : > { %1799 = vadd.xlane.f32.xlu0 %v2555_v46  ;;  %v2557_v50 = vpop.eup %2556 }
 0x5f0   : > { %v1728_v49 = vpop.xlane.xlu0 %1727 }
 0x5f1   : > { %v3454_v45 = vsub.f32 %v3356_v39, %v1728_v49 }
 0x5f2   : > { %v2559_v9 = vpop.eup %2558  ;;  %v1730_v52 = vpop.xlane.xlu1 %1729 }
 0x5f3   : > { %v1775_v53 = vmul.f32 1.442695, %v3454_v45  ;;  %v3458_v15 = vsub.f32 %v3371_v37, %v1730_v52  ;;  %1801 = vadd.xlane.f32.xlu1 %v2559_v9  ;;  %1795 = vadd.xlane.f32.xlu0 %v2557_v50  ;;  %v2561_v55 = vpop.eup %2560 }
 0x5f4   : > { %v1724_v47 = vpop.xlane.xlu0 %1723 }
 0x5f5   : > { %2562 = vpow2.f32 %v1775_v53  ;;  %v1777_v54 = vmul.f32 1.442695, %v3458_v15  ;;  %v3462_v10 = vsub.f32 %v3377_v42, %v1724_v47 }
 0x5f6   : > { %v1726_v56 = vpop.xlane.xlu1 %1725 }
 0x5f7   : > { %2564 = vpow2.f32 %v1777_v54  ;;  %v1771_v39 = vmul.f32 1.442695, %v3462_v10  ;;  %v3466_v57 = vsub.f32 %v3384_v3, %v1726_v56  ;;  %1797 = vadd.xlane.f32.xlu1 %v2561_v55 }
 0x5f9   : > { %2566 = vpow2.f32 %v1771_v39  ;;  %v1773_v37 = vmul.f32 1.442695, %v3466_v57 }
 0x5fb   : > { %2568 = vpow2.f32 %v1773_v37 }
 0x5ff   : > { %v2563_v58 = vpop.eup %2562 }
 0x600   : > { %1807 = vadd.xlane.f32.xlu0 %v2563_v58 }
 0x601   : > { %v2565_v48 = vpop.eup %2564  ;;  %v1736_v60 = vpop.xlane.xlu0 %1735 }
 0x602   : > { %v3470_v42 = vsub.f32 %v3391_v8, %v1736_v60  ;;  %1809 = vadd.xlane.f32.xlu1 %v2565_v48 }
 0x603   : > { %v2567_v62 = vpop.eup %2566  ;;  %v1738_v0 = vpop.xlane.xlu1 %1737 }
 0x604   : > { %v1783_v1 = vmul.f32 1.442695, %v3470_v42  ;;  %v3474_v3 = vsub.f32 %v3400_v59, %v1738_v0  ;;  %1803 = vadd.xlane.f32.xlu0 %v2567_v62 }
 0x605   : > { %v2569_v2 = vpop.eup %2568  ;;  %v1732_v11 = vpop.xlane.xlu0 %1731 }
 0x606   : > { %2570 = vpow2.f32 %v1783_v1  ;;  %v1785_v12 = vmul.f32 1.442695, %v3474_v3  ;;  %v3478_v16 = vsub.f32 %v3407_v13, %v1732_v11  ;;  %1805 = vadd.xlane.f32.xlu1 %v2569_v2 }
 0x607   : > { %v1734_v8 = vpop.xlane.xlu1 %1733 }
 0x608   : > { %2572 = vpow2.f32 %v1785_v12  ;;  %v1779_v17 = vmul.f32 1.442695, %v3478_v16  ;;  %v3482_v18 = vsub.f32 %v3412_v14, %v1734_v8 }
 0x60a   : > { %2574 = vpow2.f32 %v1779_v17  ;;  %v1781_v59 = vmul.f32 1.442695, %v3482_v18 }
 0x60c   : > { %2576 = vpow2.f32 %v1781_v59 }
 0x610   : > { %v2571_v5 = vpop.eup %2570 }
 0x611   : > { %1815 = vadd.xlane.f32.xlu0 %v2571_v5 }
 0x612   : > { %v2573_v7 = vpop.eup %2572 }
 0x613   : > { %v1740_v20 = vpop.xlane.xlu0 %1739  ;;  %1817 = vadd.xlane.f32.xlu1 %v2573_v7 }
 0x614   : > { %v2575_v6 = vpop.eup %2574  ;;  %v3486_v61 = vsub.f32 %v3417_v26, %v1740_v20 }
 0x615   : > { %v1742_v13 = vpop.xlane.xlu1 %1741  ;;  %1811 = vadd.xlane.f32.xlu0 %v2575_v6 }
 0x616   : > { %v2577_v19 = vpop.eup %2576  ;;  %v1787_v21 = vmul.f32 1.442695, %v3486_v61  ;;  %v3490_v14 = vsub.f32 %v3424_v31, %v1742_v13 }
 0x617   : > { %v1744_v22 = vpop.xlane.xlu0 %1743  ;;  %1813 = vadd.xlane.f32.xlu1 %v2577_v19 }
 0x618   : > { %2578 = vpow2.f32 %v1787_v21  ;;  %v1789_v23 = vmul.f32 1.442695, %v3490_v14  ;;  %v3494_v24 = vsub.f32 %v3429_v34, %v1744_v22 }
 0x619   : > { %v1746_v25 = vpop.xlane.xlu1 %1745 }
 0x61a   : > { %2580 = vpow2.f32 %v1789_v23  ;;  %v1791_v26 = vmul.f32 1.442695, %v3494_v24  ;;  %v3498_v27 = vsub.f32 %v3434_v35, %v1746_v25 }
 0x61c   : > { %2582 = vpow2.f32 %v1791_v26  ;;  %v1793_v29 = vmul.f32 1.442695, %v3498_v27 }
 0x61e   : > { %2584 = vpow2.f32 %v1793_v29 }
 0x622   : > { %v2579_v31 = vpop.eup %2578 }
 0x623   : > { %1819 = vadd.xlane.f32.xlu0 %v2579_v31 }
 0x624   : > { %v2581_v33 = vpop.eup %2580 }
 0x625   : > { %1821 = vadd.xlane.f32.xlu1 %v2581_v33 }
 0x626   : > { %v2583_v30 = vpop.eup %2582 }
 0x627   : > { %1823 = vadd.xlane.f32.xlu0 %v2583_v30 }
 0x628   : > { %v2585_v34 = vpop.eup %2584 }
 0x629   : > { %1825 = vadd.xlane.f32.xlu1 %v2585_v34 }
 0x67c   : > { %v1800_v28 = vpop.xlane.xlu0 %1799 }
 0x67d   : > { %2586 = vlog2.f32 %v1800_v28 }
 0x680   : > { %v1802_v40 = vpop.xlane.xlu1 %1801  ;;  %v1796_v35 = vpop.xlane.xlu0 %1795 }
 0x681   : > { %2588 = vlog2.f32 %v1802_v40 }
 0x682   : > { %2590 = vlog2.f32 %v1796_v35 }
 0x684   : > { %v1798_v43 = vpop.xlane.xlu1 %1797 }
 0x685   : > { %2592 = vlog2.f32 %v1798_v43 }
 0x687   : > { %v2587_v32 = vpop.eup %2586 }
 0x688   : > { %v1832_v41 = vmul.f32 0.6931472, %v2587_v32 }
 0x68a   : > { %v1861_v4 = vsub.f32 %v3438_v38, %v1832_v41 }
 0x68b   : > { %v2589_v63 = vpop.eup %2588 }
 0x68c   : > { %v2591_v46 = vpop.eup %2590  ;;  %1878 = vst.msk [vmem:[%s3506_s5 + $0x10] sm:$0xff] %vm1875_vm1, %v1861_v4  ;;  %v1834_v49 = vmul.f32 0.6931472, %v2589_v63 }
 0x68d   : > { %v1828_v50 = vmul.f32 0.6931472, %v2591_v46  ;;  %v1808_v9 = vpop.xlane.xlu0 %1807 }
 0x68e   : > { %v1862_v52 = vsub.f32 %v3446_v51, %v1834_v49  ;;  %2594 = vlog2.f32 %v1808_v9 }
 0x68f   : > { %v2593_v53 = vpop.eup %2592  ;;  %v1859_v47 = vsub.f32 %v3441_v36, %v1828_v50  ;;  %v1810_v54 = vpop.xlane.xlu1 %1809 }
 0x690   : > { %1879 = vst.msk [vmem:[%s3506_s5 + $0x18] sm:$0xff] %vm1875_vm1, %v1862_v52  ;;  %v1830_v55 = vmul.f32 0.6931472, %v2593_v53  ;;  %2596 = vlog2.f32 %v1810_v54 }
 0x691   : > { %1876 = vst.msk [vmem:[%s3506_s5] sm:$0xff] %vm1875_vm1, %v1859_v47  ;;  %v1804_v38 = vpop.xlane.xlu0 %1803 }
 0x692   : > { %v1860_v56 = vsub.f32 %v3449_v44, %v1830_v55  ;;  %2598 = vlog2.f32 %v1804_v38 }
 0x693   : > { %v1806_v39 = vpop.xlane.xlu1 %1805 }
 0x694   : > { %1877 = vst.msk [vmem:[%s3506_s5 + $0x8] sm:$0xff] %vm1875_vm1, %v1860_v56  ;;  %2600 = vlog2.f32 %v1806_v39 }
 0x698   : > { %v2595_v51 = vpop.eup %2594 }
 0x699   : > { %v1840_v36 = vmul.f32 0.6931472, %v2595_v51 }
 0x69a   : > { %v2597_v37 = vpop.eup %2596 }
 0x69b   : > { %v1865_v58 = vsub.f32 %v3454_v45, %v1840_v36  ;;  %v1842_v48 = vmul.f32 0.6931472, %v2597_v37 }
 0x69c   : > { %v2599_v60 = vpop.eup %2598 }
 0x69d   : > { %1882 = vst.msk [vmem:[%s3506_s5 + $0x30] sm:$0xff] %vm1875_vm1, %v1865_v58  ;;  %v1866_v62 = vsub.f32 %v3458_v15, %v1842_v48  ;;  %v1836_v44 = vmul.f32 0.6931472, %v2599_v60 }
 0x69e   : > { %v2601_v0 = vpop.eup %2600  ;;  %v1816_v1 = vpop.xlane.xlu0 %1815 }
 0x69f   : > { %1883 = vst.msk [vmem:[%s3506_s5 + $0x38] sm:$0xff] %vm1875_vm1, %v1866_v62  ;;  %v1863_v2 = vsub.f32 %v3462_v10, %v1836_v44  ;;  %v1838_v11 = vmul.f32 0.6931472, %v2601_v0  ;;  %2602 = vlog2.f32 %v1816_v1 }
 0x6a0   : > { %v1818_v12 = vpop.xlane.xlu1 %1817 }
 0x6a1   : > { %1880 = vst.msk [vmem:[%s3506_s5 + $0x20] sm:$0xff] %vm1875_vm1, %v1863_v2  ;;  %v1864_v45 = vsub.f32 %v3466_v57, %v1838_v11  ;;  %2604 = vlog2.f32 %v1818_v12 }
 0x6a2   : > { %v1812_v8 = vpop.xlane.xlu0 %1811 }
 0x6a3   : > { %1881 = vst.msk [vmem:[%s3506_s5 + $0x28] sm:$0xff] %vm1875_vm1, %v1864_v45  ;;  %2606 = vlog2.f32 %v1812_v8 }
 0x6a4   : > { %v1814_v15 = vpop.xlane.xlu1 %1813 }
 0x6a5   : > { %2608 = vlog2.f32 %v1814_v15 }
 0x6a9   : > { %v2603_v17 = vpop.eup %2602 }
 0x6aa   : > { %v1848_v59 = vmul.f32 0.6931472, %v2603_v17 }
 0x6ab   : > { %v2605_v10 = vpop.eup %2604 }
 0x6ac   : > { %v1869_v5 = vsub.f32 %v3470_v42, %v1848_v59  ;;  %v1850_v7 = vmul.f32 0.6931472, %v2605_v10 }
 0x6ad   : > { %v2607_v20 = vpop.eup %2606 }
 0x6ae   : > { %1886 = vst.msk [vmem:[%s3506_s5 + $0x50] sm:$0xff] %vm1875_vm1, %v1869_v5  ;;  %v1870_v57 = vsub.f32 %v3474_v3, %v1850_v7  ;;  %v1844_v6 = vmul.f32 0.6931472, %v2607_v20 }
 0x6af   : > { %v2609_v13 = vpop.eup %2608 }
 0x6b0   : > { %1887 = vst.msk [vmem:[%s3506_s5 + $0x58] sm:$0xff] %vm1875_vm1, %v1870_v57  ;;  %v1867_v19 = vsub.f32 %v3478_v16, %v1844_v6  ;;  %v1846_v21 = vmul.f32 0.6931472, %v2609_v13  ;;  %v1820_v22 = vpop.xlane.xlu0 %1819 }
 0x6b1   : > { %2610 = vlog2.f32 %v1820_v22 }
 0x6b2   : > { %1884 = vst.msk [vmem:[%s3506_s5 + $0x40] sm:$0xff] %vm1875_vm1, %v1867_v19  ;;  %v1868_v42 = vsub.f32 %v3482_v18, %v1846_v21  ;;  %v1822_v23 = vpop.xlane.xlu1 %1821 }
 0x6b3   : > { %2612 = vlog2.f32 %v1822_v23 }
 0x6b4   : > { %1885 = vst.msk [vmem:[%s3506_s5 + $0x48] sm:$0xff] %vm1875_vm1, %v1868_v42  ;;  %v1824_v3 = vpop.xlane.xlu0 %1823 }
 0x6b5   : > { %2614 = vlog2.f32 %v1824_v3 }
 0x6b6   : > { %v1826_v25 = vpop.xlane.xlu1 %1825 }
 0x6b7   : > { %2616 = vlog2.f32 %v1826_v25 }
 0x6bb   : > { %v2611_v16 = vpop.eup %2610 }
 0x6bc   : > { %v1852_v26 = vmul.f32 0.6931472, %v2611_v16 }
 0x6bd   : > { %v2613_v29 = vpop.eup %2612 }
 0x6be   : > { %v1871_v31 = vsub.f32 %v3486_v61, %v1852_v26  ;;  %v1854_v33 = vmul.f32 0.6931472, %v2613_v29 }
 0x6bf   : > { %v2615_v30 = vpop.eup %2614 }
 0x6c0   : > { %1888 = vst.msk [vmem:[%s3506_s5 + $0x60] sm:$0xff] %vm1875_vm1, %v1871_v31  ;;  %v1872_v18 = vsub.f32 %v3490_v14, %v1854_v33  ;;  %v1856_v34 = vmul.f32 0.6931472, %v2615_v30 }
 0x6c1   : > { %v2617_v28 = vpop.eup %2616 }
 0x6c2   : > { %1889 = vst.msk [vmem:[%s3506_s5 + $0x68] sm:$0xff] %vm1875_vm1, %v1872_v18  ;;  %v1873_v40 = vsub.f32 %v3494_v24, %v1856_v34  ;;  %v1858_v35 = vmul.f32 0.6931472, %v2617_v28 }
 0x6c4   : > { %1890 = vst.msk [vmem:[%s3506_s5 + $0x70] sm:$0xff] %vm1875_vm1, %v1873_v40  ;;  %v1874_v43 = vsub.f32 %v3498_v27, %v1858_v35 }
 0x6c6   : > { %1891 = vst.msk [vmem:[%s3506_s5 + $0x78] sm:$0xff] %vm1875_vm1, %v1874_v43 }
 0x6c7 PF: > { %p24_p5 = scmp.ge.s32.totalorder %s3081_s28, 4   ;;  %s3611_s17 = smov %s2826_s18 }
 0x6c8   : > { %s3612_s18 = smov %s2830_s19  ;;  %s3613_s19 = smov %s3092_s10 }
 0x6c9   : > { %s3614_s20 = smov %s3081_s28  ;;  %26 = sbr.rel (!%p24_p5) target bundleno = 12 (0xc), region = 124 }
 0x6d0   :  { %1914 = vsyncpa [#allocation3], 1 }
 0x6d1   :  { %1916 = vsyncpa [#allocation3 + $0x1], 1 }
 0x6d2   :  { %1917 = vsyncpa [#allocation5], 1 }
 0x6d3   :  { %1918 = vsyncpa [#allocation8], 1 }
 0x6d4   :  { %1919 = vsyncpa [#allocation11], 1 }

</bundles_post_ra>
